<compile_context>
chip_gen: v6e
topology: v6e:2x2x1
jax: 0.10.0
libtpu: 0.0.40
codegen_flags: <defaults>
</compile_context>

<pallas_src>
import functools

import jax
import jax.numpy as jnp
from jax import lax
from jax.experimental import pallas as pl
from jax.experimental.pallas import tpu as pltpu

EPS = 1e-5


def _basic_block_kernel(x_ref, w1_ref, g1_ref, b1_ref, w2_ref, g2_ref, b2_ref,
                        out_ref, xpad_ref, col_ref, *, height, width):
    """Fused (conv3x3 -> BN -> ReLU) x2 + residual add + ReLU.

    x_ref   : (N, C, H*W)         NCHW input with spatial flattened (lane-dense)
    w*_ref  : (C, 9*C)            conv weights; column order = (kh, kw, cin)
    g*/b*   : (C, 1)              BN gamma / beta
    out_ref : (N, C, H*W)
    xpad_ref: (N, C, (H+2)*W+2)   f32 scratch: zero-padded (one pad row top/bottom,
                                  +1 elem each end), spatially flattened activations
    col_ref : (9*C, N*H*W)        f32 scratch: im2col matrix (K on axis 0)
    """
    H, W = height, width
    N, C, HW = x_ref.shape
    M = N * HW                                   # batch-norm reduction size
    inv_m = 1.0 / float(M)

    # Lane-position masks for the left / right conv taps (hoisted, reused 2*9*N times).
    wpos = lax.broadcasted_iota(jnp.int32, (C, HW), 1) % W
    not_first_col = wpos != 0
    not_last_col = wpos != (W - 1)

    def conv_bn_relu(w_ref, g_ref, b_ref):
        # im2col from the padded, flattened scratch: tap (kh, kw) of image nn is the
        # contiguous slice starting at flat offset kh*W + kw; values that wrapped
        # across a row edge are masked to zero.
        for nn in range(N):
            for kh in range(3):
                for kw in range(3):
                    start = kh * W + kw
                    tap = xpad_ref[nn, :, start:start + HW]          # (C, HW)
                    if kw == 0:
                        tap = jnp.where(not_first_col, tap, 0.0)
                    elif kw == 2:
                        tap = jnp.where(not_last_col, tap, 0.0)
                    t = kh * 3 + kw
                    col_ref[t * C:(t + 1) * C, nn * HW:(nn + 1) * HW] = tap

        # Single MXU contraction with K = 9*C (instead of nine K=C dots).
        acc = jnp.dot(w_ref[...], col_ref[...],
                      preferred_element_type=jnp.float32)            # (C, N*H*W)

        # One-pass training-mode BatchNorm (batch mean, biased variance).
        s = jnp.sum(acc, axis=1, keepdims=True)
        ss = jnp.sum(acc * acc, axis=1, keepdims=True)
        mean = s * inv_m
        var = ss * inv_m - mean * mean
        scale = g_ref[...] * lax.rsqrt(var + EPS)
        shift = b_ref[...] - mean * scale
        return jnp.maximum(acc * scale + shift, 0.0)                 # (C, N*H*W)

    # ---- conv_block1: zero-pad x into the scratch (interior at flat offset W+1) ----
    xpad_ref[...] = jnp.zeros_like(xpad_ref)
    xpad_ref[:, :, W + 1:W + 1 + HW] = x_ref[...].astype(jnp.float32)
    y1 = conv_bn_relu(w1_ref, g1_ref, b1_ref)

    # ---- conv_block2: reuse the scratch; its zero border is still intact ----
    for nn in range(N):
        xpad_ref[nn, :, W + 1:W + 1 + HW] = y1[:, nn * HW:(nn + 1) * HW]
    y2 = conv_bn_relu(w2_ref, g2_ref, b2_ref)

    # ---- residual add + final ReLU; (C, H*W) stores are lane-dense ----
    for nn in range(N):
        res = x_ref[nn].astype(jnp.float32)                          # (C, HW)
        out = jnp.maximum(y2[:, nn * HW:(nn + 1) * HW] + res, 0.0)
        out_ref[nn] = out.astype(out_ref.dtype)


def resnet_basic_block(x_nchw, params):
    """ResnetBasicBlock forward (stride=1, downsample=None).  x_nchw: (N, C, H, W)."""
    N, C, H, W = x_nchw.shape
    HW = H * W
    x = x_nchw.reshape(N, C, HW)                 # free reshape, no transpose

    # HWIO (3,3,Cin,Cout) -> (Cout, 9*Cin); column order (kh, kw, cin) matches col_ref.
    def prep_w(w_hwio):
        return jnp.transpose(w_hwio.reshape(9 * C, C))

    args = (
        x,
        prep_w(params["w1"]), params["g1"].reshape(C, 1), params["b1"].reshape(C, 1),
        prep_w(params["w2"]), params["g2"].reshape(C, 1), params["b2"].reshape(C, 1),
    )

    vmem = pl.BlockSpec(memory_space=pltpu.MemorySpace.VMEM)   # whole array in VMEM

    out = pl.pallas_call(
        functools.partial(_basic_block_kernel, height=H, width=W),
        out_shape=jax.ShapeDtypeStruct((N, C, HW), x.dtype),
        in_specs=[vmem] * len(args),
        out_specs=vmem,
        scratch_shapes=[
            pltpu.VMEM((N, C, (H + 2) * W + 2), jnp.float32),   # padded activations
            pltpu.VMEM((9 * C, N * HW), jnp.float32),           # im2col matrix
        ],
        compiler_params=pltpu.CompilerParams(vmem_limit_bytes=32 * 1024 * 1024),
    )(*args)
    return out.reshape(N, C, H, W)


def _reference(x_nchw, params):
    """Pure-JAX reference (lax conv, NCHW) for a numerical sanity check."""
    def conv_bn_relu(x, w_hwio, g, b):
        y = lax.conv_general_dilated(
            x, w_hwio, window_strides=(1, 1), padding="SAME",
            dimension_numbers=("NCHW", "HWIO", "NCHW"),
            precision=lax.Precision.HIGHEST)
        mean = jnp.mean(y, axis=(0, 2, 3), keepdims=True)
        var = jnp.mean((y - mean) ** 2, axis=(0, 2, 3), keepdims=True)
        y = (y - mean) * lax.rsqrt(var + EPS)
        y = y * g.reshape(1, -1, 1, 1) + b.reshape(1, -1, 1, 1)
        return jnp.maximum(y, 0.0)

    out = conv_bn_relu(x_nchw, params["w1"], params["g1"], params["b1"])
    out = conv_bn_relu(out, params["w2"], params["g2"], params["b2"])
    return jnp.maximum(out + x_nchw, 0.0)


if __name__ == "__main__":
    key = jax.random.PRNGKey(0)
    N, C, H, W = 2, 4, 16, 16          # in_channels == out_channels, stride=1
    k_x, k_w1, k_w2, k_g1, k_b1, k_g2, k_b2 = jax.random.split(key, 7)

    x = jax.random.normal(k_x, (N, C, H, W), jnp.float32)
    params = {
        "w1": jax.random.normal(k_w1, (3, 3, C, C), jnp.float32) * 0.1,   # HWIO
        "g1": 1.0 + 0.1 * jax.random.normal(k_g1, (C,), jnp.float32),
        "b1": 0.1 * jax.random.normal(k_b1, (C,), jnp.float32),
        "w2": jax.random.normal(k_w2, (3, 3, C, C), jnp.float32) * 0.1,
        "g2": 1.0 + 0.1 * jax.random.normal(k_g2, (C,), jnp.float32),
        "b2": 0.1 * jax.random.normal(k_b2, (C,), jnp.float32),
    }

    out = jax.block_until_ready(resnet_basic_block(x, params))
    ref = jax.block_until_ready(_reference(x, params))

    assert out.shape == (N, C, H, W), out.shape
    err = float(jnp.max(jnp.abs(out - ref)))
    assert jnp.allclose(out, ref, rtol=1e-3, atol=1e-3), err
    print("KERNEL_OK")
</pallas_src>

<mosaic_0001>
module attributes {stable_mosaic.version = 11 : i64} {
  func.func @_basic_block_kernel(%arg0: memref<2x4x256xf32, #tpu.memory_space<vmem>>, %arg1: memref<4x36xf32, #tpu.memory_space<vmem>>, %arg2: memref<4x1xf32, #tpu.memory_space<vmem>>, %arg3: memref<4x1xf32, #tpu.memory_space<vmem>>, %arg4: memref<4x36xf32, #tpu.memory_space<vmem>>, %arg5: memref<4x1xf32, #tpu.memory_space<vmem>>, %arg6: memref<4x1xf32, #tpu.memory_space<vmem>>, %arg7: memref<2x4x256xf32, #tpu.memory_space<vmem>>, %arg8: memref<2x4x290xf32, #tpu.memory_space<vmem>>, %arg9: memref<36x512xf32, #tpu.memory_space<vmem>>) attributes {dimension_semantics = [], scalar_prefetch = 0 : i64, scratch_operands = 2 : i64, tpu.core_type = #tpu.core_type<tc>} {
    %0 = tpu.iota {dimensions = array<i32: 1>} : vector<4x256xi32>
    %c16_i32 = arith.constant 16 : i32
    %c0_i32 = arith.constant 0 : i32
    %1 = arith.cmpi eq, %c16_i32, %c0_i32 : i32
    %c1_i32 = arith.constant 1 : i32
    %2 = arith.select %1, %c1_i32, %c16_i32 : i32
    %3 = vector.broadcast %2 : i32 to vector<4x256xi32>
    %4 = arith.remsi %0, %3 : vector<4x256xi32>
    %c0_i32_0 = arith.constant 0 : i32
    %5 = vector.broadcast %c0_i32_0 : i32 to vector<4x256xi32>
    %6 = arith.cmpi ne, %4, %5 : vector<4x256xi32>
    %c0_i32_1 = arith.constant 0 : i32
    %7 = vector.broadcast %c0_i32_1 : i32 to vector<4x256xi32>
    %8 = arith.cmpi slt, %4, %7 : vector<4x256xi32>
    %c0_i32_2 = arith.constant 0 : i32
    %9 = arith.cmpi slt, %2, %c0_i32_2 : i32
    %10 = vector.broadcast %9 : i1 to vector<4x256xi1>
    %11 = vector.broadcast %10 : vector<4x256xi1> to vector<4x256xi1>
    %12 = arith.xori %8, %11 : vector<4x256xi1>
    %13 = arith.andi %12, %6 : vector<4x256xi1>
    %14 = vector.broadcast %2 : i32 to vector<4x256xi32>
    %15 = arith.addi %4, %14 : vector<4x256xi32>
    %16 = arith.select %13, %15, %4 : vector<4x256xi1>, vector<4x256xi32>
    %c0_i32_3 = arith.constant 0 : i32
    %17 = vector.broadcast %c0_i32_3 : i32 to vector<4x256xi32>
    %18 = arith.cmpi ne, %16, %17 : vector<4x256xi32>
    %c15_i32 = arith.constant 15 : i32
    %19 = vector.broadcast %c15_i32 : i32 to vector<4x256xi32>
    %20 = arith.cmpi ne, %16, %19 : vector<4x256xi32>
    %cst = arith.constant 0.000000e+00 : f32
    %21 = vector.broadcast %cst : f32 to vector<2x4x290xf32>
    %c0 = arith.constant 0 : index
    %c0_4 = arith.constant 0 : index
    %c0_5 = arith.constant 0 : index
    %22 = vector.load %arg8[%c0, %c0_4, %c0_5] : memref<2x4x290xf32, #tpu.memory_space<vmem>>, vector<2x4x290xf32>
    tpu.vector_store %arg8[%c0, %c0_4, %c0_5], %21 {strides = array<i32>} : memref<2x4x290xf32, #tpu.memory_space<vmem>>, vector<2x4x290xf32>,
    %c0_6 = arith.constant 0 : index
    %c0_7 = arith.constant 0 : index
    %c0_8 = arith.constant 0 : index
    %23 = vector.load %arg0[%c0_6, %c0_7, %c0_8] : memref<2x4x256xf32, #tpu.memory_space<vmem>>, vector<2x4x256xf32>
    %c0_9 = arith.constant 0 : index
    %c0_10 = arith.constant 0 : index
    %c17 = arith.constant 17 : index
    %24 = vector.load %arg8[%c0_9, %c0_10, %c17] : memref<2x4x290xf32, #tpu.memory_space<vmem>>, vector<2x4x256xf32>
    tpu.vector_store %arg8[%c0_9, %c0_10, %c17], %23 {strides = array<i32>} : memref<2x4x290xf32, #tpu.memory_space<vmem>>, vector<2x4x256xf32>,
    %c0_11 = arith.constant 0 : index
    %c0_12 = arith.constant 0 : index
    %c0_13 = arith.constant 0 : index
    %25 = vector.load %arg8[%c0_11, %c0_12, %c0_13] : memref<2x4x290xf32, #tpu.memory_space<vmem>>, vector<1x4x256xf32>
    %26 = vector.shape_cast %25 : vector<1x4x256xf32> to vector<4x256xf32>
    %cst_14 = arith.constant 0.000000e+00 : f32
    %27 = vector.broadcast %cst_14 : f32 to vector<4x256xf32>
    %28 = arith.select %18, %26, %27 : vector<4x256xi1>, vector<4x256xf32>
    %c0_15 = arith.constant 0 : index
    %c0_16 = arith.constant 0 : index
    %29 = vector.load %arg9[%c0_15, %c0_16] : memref<36x512xf32, #tpu.memory_space<vmem>>, vector<4x256xf32>
    tpu.vector_store %arg9[%c0_15, %c0_16], %28 {strides = array<i32>} : memref<36x512xf32, #tpu.memory_space<vmem>>, vector<4x256xf32>,
    %c0_17 = arith.constant 0 : index
    %c0_18 = arith.constant 0 : index
    %c1 = arith.constant 1 : index
    %30 = vector.load %arg8[%c0_17, %c0_18, %c1] : memref<2x4x290xf32, #tpu.memory_space<vmem>>, vector<1x4x256xf32>
    %31 = vector.shape_cast %30 : vector<1x4x256xf32> to vector<4x256xf32>
    %c4 = arith.constant 4 : index
    %c0_19 = arith.constant 0 : index
    %32 = vector.load %arg9[%c4, %c0_19] : memref<36x512xf32, #tpu.memory_space<vmem>>, vector<4x256xf32>
    tpu.vector_store %arg9[%c4, %c0_19], %31 {strides = array<i32>} : memref<36x512xf32, #tpu.memory_space<vmem>>, vector<4x256xf32>,
    %c0_20 = arith.constant 0 : index
    %c0_21 = arith.constant 0 : index
    %c2 = arith.constant 2 : index
    %33 = vector.load %arg8[%c0_20, %c0_21, %c2] : memref<2x4x290xf32, #tpu.memory_space<vmem>>, vector<1x4x256xf32>
    %34 = vector.shape_cast %33 : vector<1x4x256xf32> to vector<4x256xf32>
    %cst_22 = arith.constant 0.000000e+00 : f32
    %35 = vector.broadcast %cst_22 : f32 to vector<4x256xf32>
    %36 = arith.select %20, %34, %35 : vector<4x256xi1>, vector<4x256xf32>
    %c8 = arith.constant 8 : index
    %c0_23 = arith.constant 0 : index
    %37 = vector.load %arg9[%c8, %c0_23] : memref<36x512xf32, #tpu.memory_space<vmem>>, vector<4x256xf32>
    tpu.vector_store %arg9[%c8, %c0_23], %36 {strides = array<i32>} : memref<36x512xf32, #tpu.memory_space<vmem>>, vector<4x256xf32>,
    %c0_24 = arith.constant 0 : index
    %c0_25 = arith.constant 0 : index
    %c16 = arith.constant 16 : index
    %38 = vector.load %arg8[%c0_24, %c0_25, %c16] : memref<2x4x290xf32, #tpu.memory_space<vmem>>, vector<1x4x256xf32>
    %39 = vector.shape_cast %38 : vector<1x4x256xf32> to vector<4x256xf32>
    %cst_26 = arith.constant 0.000000e+00 : f32
    %40 = vector.broadcast %cst_26 : f32 to vector<4x256xf32>
    %41 = arith.select %18, %39, %40 : vector<4x256xi1>, vector<4x256xf32>
    %c12 = arith.constant 12 : index
    %c0_27 = arith.constant 0 : index
    %42 = vector.load %arg9[%c12, %c0_27] : memref<36x512xf32, #tpu.memory_space<vmem>>, vector<4x256xf32>
    tpu.vector_store %arg9[%c12, %c0_27], %41 {strides = array<i32>} : memref<36x512xf32, #tpu.memory_space<vmem>>, vector<4x256xf32>,
    %c0_28 = arith.constant 0 : index
    %c0_29 = arith.constant 0 : index
    %c17_30 = arith.constant 17 : index
    %43 = vector.load %arg8[%c0_28, %c0_29, %c17_30] : memref<2x4x290xf32, #tpu.memory_space<vmem>>, vector<1x4x256xf32>
    %44 = vector.shape_cast %43 : vector<1x4x256xf32> to vector<4x256xf32>
    %c16_31 = arith.constant 16 : index
    %c0_32 = arith.constant 0 : index
    %45 = vector.load %arg9[%c16_31, %c0_32] : memref<36x512xf32, #tpu.memory_space<vmem>>, vector<4x256xf32>
    tpu.vector_store %arg9[%c16_31, %c0_32], %44 {strides = array<i32>} : memref<36x512xf32, #tpu.memory_space<vmem>>, vector<4x256xf32>,
    %c0_33 = arith.constant 0 : index
    %c0_34 = arith.constant 0 : index
    %c18 = arith.constant 18 : index
    %46 = vector.load %arg8[%c0_33, %c0_34, %c18] : memref<2x4x290xf32, #tpu.memory_space<vmem>>, vector<1x4x256xf32>
    %47 = vector.shape_cast %46 : vector<1x4x256xf32> to vector<4x256xf32>
    %cst_35 = arith.constant 0.000000e+00 : f32
    %48 = vector.broadcast %cst_35 : f32 to vector<4x256xf32>
    %49 = arith.select %20, %47, %48 : vector<4x256xi1>, vector<4x256xf32>
    %c20 = arith.constant 20 : index
    %c0_36 = arith.constant 0 : index
    %50 = vector.load %arg9[%c20, %c0_36] : memref<36x512xf32, #tpu.memory_space<vmem>>, vector<4x256xf32>
    tpu.vector_store %arg9[%c20, %c0_36], %49 {strides = array<i32>} : memref<36x512xf32, #tpu.memory_space<vmem>>, vector<4x256xf32>,
    %c0_37 = arith.constant 0 : index
    %c0_38 = arith.constant 0 : index
    %c32 = arith.constant 32 : index
    %51 = vector.load %arg8[%c0_37, %c0_38, %c32] : memref<2x4x290xf32, #tpu.memory_space<vmem>>, vector<1x4x256xf32>
    %52 = vector.shape_cast %51 : vector<1x4x256xf32> to vector<4x256xf32>
    %cst_39 = arith.constant 0.000000e+00 : f32
    %53 = vector.broadcast %cst_39 : f32 to vector<4x256xf32>
    %54 = arith.select %18, %52, %53 : vector<4x256xi1>, vector<4x256xf32>
    %c24 = arith.constant 24 : index
    %c0_40 = arith.constant 0 : index
    %55 = vector.load %arg9[%c24, %c0_40] : memref<36x512xf32, #tpu.memory_space<vmem>>, vector<4x256xf32>
    tpu.vector_store %arg9[%c24, %c0_40], %54 {strides = array<i32>} : memref<36x512xf32, #tpu.memory_space<vmem>>, vector<4x256xf32>,
    %c0_41 = arith.constant 0 : index
    %c0_42 = arith.constant 0 : index
    %c33 = arith.constant 33 : index
    %56 = vector.load %arg8[%c0_41, %c0_42, %c33] : memref<2x4x290xf32, #tpu.memory_space<vmem>>, vector<1x4x256xf32>
    %57 = vector.shape_cast %56 : vector<1x4x256xf32> to vector<4x256xf32>
    %c28 = arith.constant 28 : index
    %c0_43 = arith.constant 0 : index
    %58 = vector.load %arg9[%c28, %c0_43] : memref<36x512xf32, #tpu.memory_space<vmem>>, vector<4x256xf32>
    tpu.vector_store %arg9[%c28, %c0_43], %57 {strides = array<i32>} : memref<36x512xf32, #tpu.memory_space<vmem>>, vector<4x256xf32>,
    %c0_44 = arith.constant 0 : index
    %c0_45 = arith.constant 0 : index
    %c34 = arith.constant 34 : index
    %59 = vector.load %arg8[%c0_44, %c0_45, %c34] : memref<2x4x290xf32, #tpu.memory_space<vmem>>, vector<1x4x256xf32>
    %60 = vector.shape_cast %59 : vector<1x4x256xf32> to vector<4x256xf32>
    %cst_46 = arith.constant 0.000000e+00 : f32
    %61 = vector.broadcast %cst_46 : f32 to vector<4x256xf32>
    %62 = arith.select %20, %60, %61 : vector<4x256xi1>, vector<4x256xf32>
    %c32_47 = arith.constant 32 : index
    %c0_48 = arith.constant 0 : index
    %63 = vector.load %arg9[%c32_47, %c0_48] : memref<36x512xf32, #tpu.memory_space<vmem>>, vector<4x256xf32>
    tpu.vector_store %arg9[%c32_47, %c0_48], %62 {strides = array<i32>} : memref<36x512xf32, #tpu.memory_space<vmem>>, vector<4x256xf32>,
    %c1_49 = arith.constant 1 : index
    %c0_50 = arith.constant 0 : index
    %c0_51 = arith.constant 0 : index
    %64 = vector.load %arg8[%c1_49, %c0_50, %c0_51] : memref<2x4x290xf32, #tpu.memory_space<vmem>>, vector<1x4x256xf32>
    %65 = vector.shape_cast %64 : vector<1x4x256xf32> to vector<4x256xf32>
    %cst_52 = arith.constant 0.000000e+00 : f32
    %66 = vector.broadcast %cst_52 : f32 to vector<4x256xf32>
    %67 = arith.select %18, %65, %66 : vector<4x256xi1>, vector<4x256xf32>
    %c0_53 = arith.constant 0 : index
    %c256 = arith.constant 256 : index
    %68 = vector.load %arg9[%c0_53, %c256] : memref<36x512xf32, #tpu.memory_space<vmem>>, vector<4x256xf32>
    tpu.vector_store %arg9[%c0_53, %c256], %67 {strides = array<i32>} : memref<36x512xf32, #tpu.memory_space<vmem>>, vector<4x256xf32>,
    %c1_54 = arith.constant 1 : index
    %c0_55 = arith.constant 0 : index
    %c1_56 = arith.constant 1 : index
    %69 = vector.load %arg8[%c1_54, %c0_55, %c1_56] : memref<2x4x290xf32, #tpu.memory_space<vmem>>, vector<1x4x256xf32>
    %70 = vector.shape_cast %69 : vector<1x4x256xf32> to vector<4x256xf32>
    %c4_57 = arith.constant 4 : index
    %c256_58 = arith.constant 256 : index
    %71 = vector.load %arg9[%c4_57, %c256_58] : memref<36x512xf32, #tpu.memory_space<vmem>>, vector<4x256xf32>
    tpu.vector_store %arg9[%c4_57, %c256_58], %70 {strides = array<i32>} : memref<36x512xf32, #tpu.memory_space<vmem>>, vector<4x256xf32>,
    %c1_59 = arith.constant 1 : index
    %c0_60 = arith.constant 0 : index
    %c2_61 = arith.constant 2 : index
    %72 = vector.load %arg8[%c1_59, %c0_60, %c2_61] : memref<2x4x290xf32, #tpu.memory_space<vmem>>, vector<1x4x256xf32>
    %73 = vector.shape_cast %72 : vector<1x4x256xf32> to vector<4x256xf32>
    %cst_62 = arith.constant 0.000000e+00 : f32
    %74 = vector.broadcast %cst_62 : f32 to vector<4x256xf32>
    %75 = arith.select %20, %73, %74 : vector<4x256xi1>, vector<4x256xf32>
    %c8_63 = arith.constant 8 : index
    %c256_64 = arith.constant 256 : index
    %76 = vector.load %arg9[%c8_63, %c256_64] : memref<36x512xf32, #tpu.memory_space<vmem>>, vector<4x256xf32>
    tpu.vector_store %arg9[%c8_63, %c256_64], %75 {strides = array<i32>} : memref<36x512xf32, #tpu.memory_space<vmem>>, vector<4x256xf32>,
    %c1_65 = arith.constant 1 : index
    %c0_66 = arith.constant 0 : index
    %c16_67 = arith.constant 16 : index
    %77 = vector.load %arg8[%c1_65, %c0_66, %c16_67] : memref<2x4x290xf32, #tpu.memory_space<vmem>>, vector<1x4x256xf32>
    %78 = vector.shape_cast %77 : vector<1x4x256xf32> to vector<4x256xf32>
    %cst_68 = arith.constant 0.000000e+00 : f32
    %79 = vector.broadcast %cst_68 : f32 to vector<4x256xf32>
    %80 = arith.select %18, %78, %79 : vector<4x256xi1>, vector<4x256xf32>
    %c12_69 = arith.constant 12 : index
    %c256_70 = arith.constant 256 : index
    %81 = vector.load %arg9[%c12_69, %c256_70] : memref<36x512xf32, #tpu.memory_space<vmem>>, vector<4x256xf32>
    tpu.vector_store %arg9[%c12_69, %c256_70], %80 {strides = array<i32>} : memref<36x512xf32, #tpu.memory_space<vmem>>, vector<4x256xf32>,
    %c1_71 = arith.constant 1 : index
    %c0_72 = arith.constant 0 : index
    %c17_73 = arith.constant 17 : index
    %82 = vector.load %arg8[%c1_71, %c0_72, %c17_73] : memref<2x4x290xf32, #tpu.memory_space<vmem>>, vector<1x4x256xf32>
    %83 = vector.shape_cast %82 : vector<1x4x256xf32> to vector<4x256xf32>
    %c16_74 = arith.constant 16 : index
    %c256_75 = arith.constant 256 : index
    %84 = vector.load %arg9[%c16_74, %c256_75] : memref<36x512xf32, #tpu.memory_space<vmem>>, vector<4x256xf32>
    tpu.vector_store %arg9[%c16_74, %c256_75], %83 {strides = array<i32>} : memref<36x512xf32, #tpu.memory_space<vmem>>, vector<4x256xf32>,
    %c1_76 = arith.constant 1 : index
    %c0_77 = arith.constant 0 : index
    %c18_78 = arith.constant 18 : index
    %85 = vector.load %arg8[%c1_76, %c0_77, %c18_78] : memref<2x4x290xf32, #tpu.memory_space<vmem>>, vector<1x4x256xf32>
    %86 = vector.shape_cast %85 : vector<1x4x256xf32> to vector<4x256xf32>
    %cst_79 = arith.constant 0.000000e+00 : f32
    %87 = vector.broadcast %cst_79 : f32 to vector<4x256xf32>
    %88 = arith.select %20, %86, %87 : vector<4x256xi1>, vector<4x256xf32>
    %c20_80 = arith.constant 20 : index
    %c256_81 = arith.constant 256 : index
    %89 = vector.load %arg9[%c20_80, %c256_81] : memref<36x512xf32, #tpu.memory_space<vmem>>, vector<4x256xf32>
    tpu.vector_store %arg9[%c20_80, %c256_81], %88 {strides = array<i32>} : memref<36x512xf32, #tpu.memory_space<vmem>>, vector<4x256xf32>,
    %c1_82 = arith.constant 1 : index
    %c0_83 = arith.constant 0 : index
    %c32_84 = arith.constant 32 : index
    %90 = vector.load %arg8[%c1_82, %c0_83, %c32_84] : memref<2x4x290xf32, #tpu.memory_space<vmem>>, vector<1x4x256xf32>
    %91 = vector.shape_cast %90 : vector<1x4x256xf32> to vector<4x256xf32>
    %cst_85 = arith.constant 0.000000e+00 : f32
    %92 = vector.broadcast %cst_85 : f32 to vector<4x256xf32>
    %93 = arith.select %18, %91, %92 : vector<4x256xi1>, vector<4x256xf32>
    %c24_86 = arith.constant 24 : index
    %c256_87 = arith.constant 256 : index
    %94 = vector.load %arg9[%c24_86, %c256_87] : memref<36x512xf32, #tpu.memory_space<vmem>>, vector<4x256xf32>
    tpu.vector_store %arg9[%c24_86, %c256_87], %93 {strides = array<i32>} : memref<36x512xf32, #tpu.memory_space<vmem>>, vector<4x256xf32>,
    %c1_88 = arith.constant 1 : index
    %c0_89 = arith.constant 0 : index
    %c33_90 = arith.constant 33 : index
    %95 = vector.load %arg8[%c1_88, %c0_89, %c33_90] : memref<2x4x290xf32, #tpu.memory_space<vmem>>, vector<1x4x256xf32>
    %96 = vector.shape_cast %95 : vector<1x4x256xf32> to vector<4x256xf32>
    %c28_91 = arith.constant 28 : index
    %c256_92 = arith.constant 256 : index
    %97 = vector.load %arg9[%c28_91, %c256_92] : memref<36x512xf32, #tpu.memory_space<vmem>>, vector<4x256xf32>
    tpu.vector_store %arg9[%c28_91, %c256_92], %96 {strides = array<i32>} : memref<36x512xf32, #tpu.memory_space<vmem>>, vector<4x256xf32>,
    %c1_93 = arith.constant 1 : index
    %c0_94 = arith.constant 0 : index
    %c34_95 = arith.constant 34 : index
    %98 = vector.load %arg8[%c1_93, %c0_94, %c34_95] : memref<2x4x290xf32, #tpu.memory_space<vmem>>, vector<1x4x256xf32>
    %99 = vector.shape_cast %98 : vector<1x4x256xf32> to vector<4x256xf32>
    %cst_96 = arith.constant 0.000000e+00 : f32
    %100 = vector.broadcast %cst_96 : f32 to vector<4x256xf32>
    %101 = arith.select %20, %99, %100 : vector<4x256xi1>, vector<4x256xf32>
    %c32_97 = arith.constant 32 : index
    %c256_98 = arith.constant 256 : index
    %102 = vector.load %arg9[%c32_97, %c256_98] : memref<36x512xf32, #tpu.memory_space<vmem>>, vector<4x256xf32>
    tpu.vector_store %arg9[%c32_97, %c256_98], %101 {strides = array<i32>} : memref<36x512xf32, #tpu.memory_space<vmem>>, vector<4x256xf32>,
    %c0_99 = arith.constant 0 : index
    %c0_100 = arith.constant 0 : index
    %103 = vector.load %arg1[%c0_99, %c0_100] : memref<4x36xf32, #tpu.memory_space<vmem>>, vector<4x36xf32>
    %c0_101 = arith.constant 0 : index
    %c0_102 = arith.constant 0 : index
    %104 = vector.load %arg9[%c0_101, %c0_102] : memref<36x512xf32, #tpu.memory_space<vmem>>, vector<36x512xf32>
    %cst_103 = arith.constant dense<0.000000e+00> : vector<4x512xf32>
    %105 = tpu.matmul %103, %104, %cst_103 {dimension_numbers = #tpu.dot_dimension_numbers<[1], [0], [0], [1], [0, 0, 1, 1], [], []>} : vector<4x36xf32>, vector<36x512xf32>, vector<4x512xf32> -> vector<4x512xf32>
    %cst_104 = arith.constant dense<0.000000e+00> : vector<4xf32>
    %106 = vector.multi_reduction <add>, %105, %cst_104 [1] : vector<4x512xf32> to vector<4xf32>
    %107 = vector.shape_cast %106 : vector<4xf32> to vector<4x1xf32>
    %108 = arith.mulf %105, %105 : vector<4x512xf32>
    %cst_105 = arith.constant dense<0.000000e+00> : vector<4xf32>
    %109 = vector.multi_reduction <add>, %108, %cst_105 [1] : vector<4x512xf32> to vector<4xf32>
    %110 = vector.shape_cast %109 : vector<4xf32> to vector<4x1xf32>
    %cst_106 = arith.constant 0.001953125 : f32
    %111 = vector.broadcast %cst_106 : f32 to vector<4x1xf32>
    %112 = arith.mulf %107, %111 : vector<4x1xf32>
    %cst_107 = arith.constant 0.001953125 : f32
    %113 = vector.broadcast %cst_107 : f32 to vector<4x1xf32>
    %114 = arith.mulf %110, %113 : vector<4x1xf32>
    %115 = arith.mulf %112, %112 : vector<4x1xf32>
    %116 = arith.subf %114, %115 : vector<4x1xf32>
    %c0_108 = arith.constant 0 : index
    %c0_109 = arith.constant 0 : index
    %117 = vector.load %arg2[%c0_108, %c0_109] : memref<4x1xf32, #tpu.memory_space<vmem>>, vector<4x1xf32>
    %cst_110 = arith.constant 9.99999974E-6 : f32
    %118 = vector.broadcast %cst_110 : f32 to vector<4x1xf32>
    %119 = arith.addf %116, %118 : vector<4x1xf32>
    %120 = math.rsqrt %119 : vector<4x1xf32>
    %121 = arith.mulf %117, %120 : vector<4x1xf32>
    %c0_111 = arith.constant 0 : index
    %c0_112 = arith.constant 0 : index
    %122 = vector.load %arg3[%c0_111, %c0_112] : memref<4x1xf32, #tpu.memory_space<vmem>>, vector<4x1xf32>
    %123 = arith.mulf %112, %121 : vector<4x1xf32>
    %124 = arith.subf %122, %123 : vector<4x1xf32>
    %125 = vector.broadcast %121 : vector<4x1xf32> to vector<4x512xf32>
    %126 = arith.mulf %105, %125 : vector<4x512xf32>
    %127 = vector.broadcast %124 : vector<4x1xf32> to vector<4x512xf32>
    %128 = arith.addf %126, %127 : vector<4x512xf32>
    %cst_113 = arith.constant 0.000000e+00 : f32
    %129 = vector.broadcast %cst_113 : f32 to vector<4x512xf32>
    %130 = arith.maximumf %128, %129 : vector<4x512xf32>
    %131 = vector.extract_strided_slice %130 {offsets = [0, 0], sizes = [4, 256], strides = [1, 1]} : vector<4x512xf32> to vector<4x256xf32>
    %c0_114 = arith.constant 0 : index
    %c0_115 = arith.constant 0 : index
    %c17_116 = arith.constant 17 : index
    %132 = vector.load %arg8[%c0_114, %c0_115, %c17_116] : memref<2x4x290xf32, #tpu.memory_space<vmem>>, vector<1x4x256xf32>
    %133 = vector.shape_cast %132 : vector<1x4x256xf32> to vector<4x256xf32>
    %134 = vector.shape_cast %131 : vector<4x256xf32> to vector<1x4x256xf32>
    tpu.vector_store %arg8[%c0_114, %c0_115, %c17_116], %134 {strides = array<i32>} : memref<2x4x290xf32, #tpu.memory_space<vmem>>, vector<1x4x256xf32>,
    %135 = vector.extract_strided_slice %130 {offsets = [0, 256], sizes = [4, 256], strides = [1, 1]} : vector<4x512xf32> to vector<4x256xf32>
    %c1_117 = arith.constant 1 : index
    %c0_118 = arith.constant 0 : index
    %c17_119 = arith.constant 17 : index
    %136 = vector.load %arg8[%c1_117, %c0_118, %c17_119] : memref<2x4x290xf32, #tpu.memory_space<vmem>>, vector<1x4x256xf32>
    %137 = vector.shape_cast %136 : vector<1x4x256xf32> to vector<4x256xf32>
    %138 = vector.shape_cast %135 : vector<4x256xf32> to vector<1x4x256xf32>
    tpu.vector_store %arg8[%c1_117, %c0_118, %c17_119], %138 {strides = array<i32>} : memref<2x4x290xf32, #tpu.memory_space<vmem>>, vector<1x4x256xf32>,
    %c0_120 = arith.constant 0 : index
    %c0_121 = arith.constant 0 : index
    %c0_122 = arith.constant 0 : index
    %139 = vector.load %arg8[%c0_120, %c0_121, %c0_122] : memref<2x4x290xf32, #tpu.memory_space<vmem>>, vector<1x4x256xf32>
    %140 = vector.shape_cast %139 : vector<1x4x256xf32> to vector<4x256xf32>
    %cst_123 = arith.constant 0.000000e+00 : f32
    %141 = vector.broadcast %cst_123 : f32 to vector<4x256xf32>
    %142 = arith.select %18, %140, %141 : vector<4x256xi1>, vector<4x256xf32>
    %c0_124 = arith.constant 0 : index
    %c0_125 = arith.constant 0 : index
    %143 = vector.load %arg9[%c0_124, %c0_125] : memref<36x512xf32, #tpu.memory_space<vmem>>, vector<4x256xf32>
    tpu.vector_store %arg9[%c0_124, %c0_125], %142 {strides = array<i32>} : memref<36x512xf32, #tpu.memory_space<vmem>>, vector<4x256xf32>,
    %c0_126 = arith.constant 0 : index
    %c0_127 = arith.constant 0 : index
    %c1_128 = arith.constant 1 : index
    %144 = vector.load %arg8[%c0_126, %c0_127, %c1_128] : memref<2x4x290xf32, #tpu.memory_space<vmem>>, vector<1x4x256xf32>
    %145 = vector.shape_cast %144 : vector<1x4x256xf32> to vector<4x256xf32>
    %c4_129 = arith.constant 4 : index
    %c0_130 = arith.constant 0 : index
    %146 = vector.load %arg9[%c4_129, %c0_130] : memref<36x512xf32, #tpu.memory_space<vmem>>, vector<4x256xf32>
    tpu.vector_store %arg9[%c4_129, %c0_130], %145 {strides = array<i32>} : memref<36x512xf32, #tpu.memory_space<vmem>>, vector<4x256xf32>,
    %c0_131 = arith.constant 0 : index
    %c0_132 = arith.constant 0 : index
    %c2_133 = arith.constant 2 : index
    %147 = vector.load %arg8[%c0_131, %c0_132, %c2_133] : memref<2x4x290xf32, #tpu.memory_space<vmem>>, vector<1x4x256xf32>
    %148 = vector.shape_cast %147 : vector<1x4x256xf32> to vector<4x256xf32>
    %cst_134 = arith.constant 0.000000e+00 : f32
    %149 = vector.broadcast %cst_134 : f32 to vector<4x256xf32>
    %150 = arith.select %20, %148, %149 : vector<4x256xi1>, vector<4x256xf32>
    %c8_135 = arith.constant 8 : index
    %c0_136 = arith.constant 0 : index
    %151 = vector.load %arg9[%c8_135, %c0_136] : memref<36x512xf32, #tpu.memory_space<vmem>>, vector<4x256xf32>
    tpu.vector_store %arg9[%c8_135, %c0_136], %150 {strides = array<i32>} : memref<36x512xf32, #tpu.memory_space<vmem>>, vector<4x256xf32>,
    %c0_137 = arith.constant 0 : index
    %c0_138 = arith.constant 0 : index
    %c16_139 = arith.constant 16 : index
    %152 = vector.load %arg8[%c0_137, %c0_138, %c16_139] : memref<2x4x290xf32, #tpu.memory_space<vmem>>, vector<1x4x256xf32>
    %153 = vector.shape_cast %152 : vector<1x4x256xf32> to vector<4x256xf32>
    %cst_140 = arith.constant 0.000000e+00 : f32
    %154 = vector.broadcast %cst_140 : f32 to vector<4x256xf32>
    %155 = arith.select %18, %153, %154 : vector<4x256xi1>, vector<4x256xf32>
    %c12_141 = arith.constant 12 : index
    %c0_142 = arith.constant 0 : index
    %156 = vector.load %arg9[%c12_141, %c0_142] : memref<36x512xf32, #tpu.memory_space<vmem>>, vector<4x256xf32>
    tpu.vector_store %arg9[%c12_141, %c0_142], %155 {strides = array<i32>} : memref<36x512xf32, #tpu.memory_space<vmem>>, vector<4x256xf32>,
    %c0_143 = arith.constant 0 : index
    %c0_144 = arith.constant 0 : index
    %c17_145 = arith.constant 17 : index
    %157 = vector.load %arg8[%c0_143, %c0_144, %c17_145] : memref<2x4x290xf32, #tpu.memory_space<vmem>>, vector<1x4x256xf32>
    %158 = vector.shape_cast %157 : vector<1x4x256xf32> to vector<4x256xf32>
    %c16_146 = arith.constant 16 : index
    %c0_147 = arith.constant 0 : index
    %159 = vector.load %arg9[%c16_146, %c0_147] : memref<36x512xf32, #tpu.memory_space<vmem>>, vector<4x256xf32>
    tpu.vector_store %arg9[%c16_146, %c0_147], %158 {strides = array<i32>} : memref<36x512xf32, #tpu.memory_space<vmem>>, vector<4x256xf32>,
    %c0_148 = arith.constant 0 : index
    %c0_149 = arith.constant 0 : index
    %c18_150 = arith.constant 18 : index
    %160 = vector.load %arg8[%c0_148, %c0_149, %c18_150] : memref<2x4x290xf32, #tpu.memory_space<vmem>>, vector<1x4x256xf32>
    %161 = vector.shape_cast %160 : vector<1x4x256xf32> to vector<4x256xf32>
    %cst_151 = arith.constant 0.000000e+00 : f32
    %162 = vector.broadcast %cst_151 : f32 to vector<4x256xf32>
    %163 = arith.select %20, %161, %162 : vector<4x256xi1>, vector<4x256xf32>
    %c20_152 = arith.constant 20 : index
    %c0_153 = arith.constant 0 : index
    %164 = vector.load %arg9[%c20_152, %c0_153] : memref<36x512xf32, #tpu.memory_space<vmem>>, vector<4x256xf32>
    tpu.vector_store %arg9[%c20_152, %c0_153], %163 {strides = array<i32>} : memref<36x512xf32, #tpu.memory_space<vmem>>, vector<4x256xf32>,
    %c0_154 = arith.constant 0 : index
    %c0_155 = arith.constant 0 : index
    %c32_156 = arith.constant 32 : index
    %165 = vector.load %arg8[%c0_154, %c0_155, %c32_156] : memref<2x4x290xf32, #tpu.memory_space<vmem>>, vector<1x4x256xf32>
    %166 = vector.shape_cast %165 : vector<1x4x256xf32> to vector<4x256xf32>
    %cst_157 = arith.constant 0.000000e+00 : f32
    %167 = vector.broadcast %cst_157 : f32 to vector<4x256xf32>
    %168 = arith.select %18, %166, %167 : vector<4x256xi1>, vector<4x256xf32>
    %c24_158 = arith.constant 24 : index
    %c0_159 = arith.constant 0 : index
    %169 = vector.load %arg9[%c24_158, %c0_159] : memref<36x512xf32, #tpu.memory_space<vmem>>, vector<4x256xf32>
    tpu.vector_store %arg9[%c24_158, %c0_159], %168 {strides = array<i32>} : memref<36x512xf32, #tpu.memory_space<vmem>>, vector<4x256xf32>,
    %c0_160 = arith.constant 0 : index
    %c0_161 = arith.constant 0 : index
    %c33_162 = arith.constant 33 : index
    %170 = vector.load %arg8[%c0_160, %c0_161, %c33_162] : memref<2x4x290xf32, #tpu.memory_space<vmem>>, vector<1x4x256xf32>
    %171 = vector.shape_cast %170 : vector<1x4x256xf32> to vector<4x256xf32>
    %c28_163 = arith.constant 28 : index
    %c0_164 = arith.constant 0 : index
    %172 = vector.load %arg9[%c28_163, %c0_164] : memref<36x512xf32, #tpu.memory_space<vmem>>, vector<4x256xf32>
    tpu.vector_store %arg9[%c28_163, %c0_164], %171 {strides = array<i32>} : memref<36x512xf32, #tpu.memory_space<vmem>>, vector<4x256xf32>,
    %c0_165 = arith.constant 0 : index
    %c0_166 = arith.constant 0 : index
    %c34_167 = arith.constant 34 : index
    %173 = vector.load %arg8[%c0_165, %c0_166, %c34_167] : memref<2x4x290xf32, #tpu.memory_space<vmem>>, vector<1x4x256xf32>
    %174 = vector.shape_cast %173 : vector<1x4x256xf32> to vector<4x256xf32>
    %cst_168 = arith.constant 0.000000e+00 : f32
    %175 = vector.broadcast %cst_168 : f32 to vector<4x256xf32>
    %176 = arith.select %20, %174, %175 : vector<4x256xi1>, vector<4x256xf32>
    %c32_169 = arith.constant 32 : index
    %c0_170 = arith.constant 0 : index
    %177 = vector.load %arg9[%c32_169, %c0_170] : memref<36x512xf32, #tpu.memory_space<vmem>>, vector<4x256xf32>
    tpu.vector_store %arg9[%c32_169, %c0_170], %176 {strides = array<i32>} : memref<36x512xf32, #tpu.memory_space<vmem>>, vector<4x256xf32>,
    %c1_171 = arith.constant 1 : index
    %c0_172 = arith.constant 0 : index
    %c0_173 = arith.constant 0 : index
    %178 = vector.load %arg8[%c1_171, %c0_172, %c0_173] : memref<2x4x290xf32, #tpu.memory_space<vmem>>, vector<1x4x256xf32>
    %179 = vector.shape_cast %178 : vector<1x4x256xf32> to vector<4x256xf32>
    %cst_174 = arith.constant 0.000000e+00 : f32
    %180 = vector.broadcast %cst_174 : f32 to vector<4x256xf32>
    %181 = arith.select %18, %179, %180 : vector<4x256xi1>, vector<4x256xf32>
    %c0_175 = arith.constant 0 : index
    %c256_176 = arith.constant 256 : index
    %182 = vector.load %arg9[%c0_175, %c256_176] : memref<36x512xf32, #tpu.memory_space<vmem>>, vector<4x256xf32>
    tpu.vector_store %arg9[%c0_175, %c256_176], %181 {strides = array<i32>} : memref<36x512xf32, #tpu.memory_space<vmem>>, vector<4x256xf32>,
    %c1_177 = arith.constant 1 : index
    %c0_178 = arith.constant 0 : index
    %c1_179 = arith.constant 1 : index
    %183 = vector.load %arg8[%c1_177, %c0_178, %c1_179] : memref<2x4x290xf32, #tpu.memory_space<vmem>>, vector<1x4x256xf32>
    %184 = vector.shape_cast %183 : vector<1x4x256xf32> to vector<4x256xf32>
    %c4_180 = arith.constant 4 : index
    %c256_181 = arith.constant 256 : index
    %185 = vector.load %arg9[%c4_180, %c256_181] : memref<36x512xf32, #tpu.memory_space<vmem>>, vector<4x256xf32>
    tpu.vector_store %arg9[%c4_180, %c256_181], %184 {strides = array<i32>} : memref<36x512xf32, #tpu.memory_space<vmem>>, vector<4x256xf32>,
    %c1_182 = arith.constant 1 : index
    %c0_183 = arith.constant 0 : index
    %c2_184 = arith.constant 2 : index
    %186 = vector.load %arg8[%c1_182, %c0_183, %c2_184] : memref<2x4x290xf32, #tpu.memory_space<vmem>>, vector<1x4x256xf32>
    %187 = vector.shape_cast %186 : vector<1x4x256xf32> to vector<4x256xf32>
    %cst_185 = arith.constant 0.000000e+00 : f32
    %188 = vector.broadcast %cst_185 : f32 to vector<4x256xf32>
    %189 = arith.select %20, %187, %188 : vector<4x256xi1>, vector<4x256xf32>
    %c8_186 = arith.constant 8 : index
    %c256_187 = arith.constant 256 : index
    %190 = vector.load %arg9[%c8_186, %c256_187] : memref<36x512xf32, #tpu.memory_space<vmem>>, vector<4x256xf32>
    tpu.vector_store %arg9[%c8_186, %c256_187], %189 {strides = array<i32>} : memref<36x512xf32, #tpu.memory_space<vmem>>, vector<4x256xf32>,
    %c1_188 = arith.constant 1 : index
    %c0_189 = arith.constant 0 : index
    %c16_190 = arith.constant 16 : index
    %191 = vector.load %arg8[%c1_188, %c0_189, %c16_190] : memref<2x4x290xf32, #tpu.memory_space<vmem>>, vector<1x4x256xf32>
    %192 = vector.shape_cast %191 : vector<1x4x256xf32> to vector<4x256xf32>
    %cst_191 = arith.constant 0.000000e+00 : f32
    %193 = vector.broadcast %cst_191 : f32 to vector<4x256xf32>
    %194 = arith.select %18, %192, %193 : vector<4x256xi1>, vector<4x256xf32>
    %c12_192 = arith.constant 12 : index
    %c256_193 = arith.constant 256 : index
    %195 = vector.load %arg9[%c12_192, %c256_193] : memref<36x512xf32, #tpu.memory_space<vmem>>, vector<4x256xf32>
    tpu.vector_store %arg9[%c12_192, %c256_193], %194 {strides = array<i32>} : memref<36x512xf32, #tpu.memory_space<vmem>>, vector<4x256xf32>,
    %c1_194 = arith.constant 1 : index
    %c0_195 = arith.constant 0 : index
    %c17_196 = arith.constant 17 : index
    %196 = vector.load %arg8[%c1_194, %c0_195, %c17_196] : memref<2x4x290xf32, #tpu.memory_space<vmem>>, vector<1x4x256xf32>
    %197 = vector.shape_cast %196 : vector<1x4x256xf32> to vector<4x256xf32>
    %c16_197 = arith.constant 16 : index
    %c256_198 = arith.constant 256 : index
    %198 = vector.load %arg9[%c16_197, %c256_198] : memref<36x512xf32, #tpu.memory_space<vmem>>, vector<4x256xf32>
    tpu.vector_store %arg9[%c16_197, %c256_198], %197 {strides = array<i32>} : memref<36x512xf32, #tpu.memory_space<vmem>>, vector<4x256xf32>,
    %c1_199 = arith.constant 1 : index
    %c0_200 = arith.constant 0 : index
    %c18_201 = arith.constant 18 : index
    %199 = vector.load %arg8[%c1_199, %c0_200, %c18_201] : memref<2x4x290xf32, #tpu.memory_space<vmem>>, vector<1x4x256xf32>
    %200 = vector.shape_cast %199 : vector<1x4x256xf32> to vector<4x256xf32>
    %cst_202 = arith.constant 0.000000e+00 : f32
    %201 = vector.broadcast %cst_202 : f32 to vector<4x256xf32>
    %202 = arith.select %20, %200, %201 : vector<4x256xi1>, vector<4x256xf32>
    %c20_203 = arith.constant 20 : index
    %c256_204 = arith.constant 256 : index
    %203 = vector.load %arg9[%c20_203, %c256_204] : memref<36x512xf32, #tpu.memory_space<vmem>>, vector<4x256xf32>
    tpu.vector_store %arg9[%c20_203, %c256_204], %202 {strides = array<i32>} : memref<36x512xf32, #tpu.memory_space<vmem>>, vector<4x256xf32>,
    %c1_205 = arith.constant 1 : index
    %c0_206 = arith.constant 0 : index
    %c32_207 = arith.constant 32 : index
    %204 = vector.load %arg8[%c1_205, %c0_206, %c32_207] : memref<2x4x290xf32, #tpu.memory_space<vmem>>, vector<1x4x256xf32>
    %205 = vector.shape_cast %204 : vector<1x4x256xf32> to vector<4x256xf32>
    %cst_208 = arith.constant 0.000000e+00 : f32
    %206 = vector.broadcast %cst_208 : f32 to vector<4x256xf32>
    %207 = arith.select %18, %205, %206 : vector<4x256xi1>, vector<4x256xf32>
    %c24_209 = arith.constant 24 : index
    %c256_210 = arith.constant 256 : index
    %208 = vector.load %arg9[%c24_209, %c256_210] : memref<36x512xf32, #tpu.memory_space<vmem>>, vector<4x256xf32>
    tpu.vector_store %arg9[%c24_209, %c256_210], %207 {strides = array<i32>} : memref<36x512xf32, #tpu.memory_space<vmem>>, vector<4x256xf32>,
    %c1_211 = arith.constant 1 : index
    %c0_212 = arith.constant 0 : index
    %c33_213 = arith.constant 33 : index
    %209 = vector.load %arg8[%c1_211, %c0_212, %c33_213] : memref<2x4x290xf32, #tpu.memory_space<vmem>>, vector<1x4x256xf32>
    %210 = vector.shape_cast %209 : vector<1x4x256xf32> to vector<4x256xf32>
    %c28_214 = arith.constant 28 : index
    %c256_215 = arith.constant 256 : index
    %211 = vector.load %arg9[%c28_214, %c256_215] : memref<36x512xf32, #tpu.memory_space<vmem>>, vector<4x256xf32>
    tpu.vector_store %arg9[%c28_214, %c256_215], %210 {strides = array<i32>} : memref<36x512xf32, #tpu.memory_space<vmem>>, vector<4x256xf32>,
    %c1_216 = arith.constant 1 : index
    %c0_217 = arith.constant 0 : index
    %c34_218 = arith.constant 34 : index
    %212 = vector.load %arg8[%c1_216, %c0_217, %c34_218] : memref<2x4x290xf32, #tpu.memory_space<vmem>>, vector<1x4x256xf32>
    %213 = vector.shape_cast %212 : vector<1x4x256xf32> to vector<4x256xf32>
    %cst_219 = arith.constant 0.000000e+00 : f32
    %214 = vector.broadcast %cst_219 : f32 to vector<4x256xf32>
    %215 = arith.select %20, %213, %214 : vector<4x256xi1>, vector<4x256xf32>
    %c32_220 = arith.constant 32 : index
    %c256_221 = arith.constant 256 : index
    %216 = vector.load %arg9[%c32_220, %c256_221] : memref<36x512xf32, #tpu.memory_space<vmem>>, vector<4x256xf32>
    tpu.vector_store %arg9[%c32_220, %c256_221], %215 {strides = array<i32>} : memref<36x512xf32, #tpu.memory_space<vmem>>, vector<4x256xf32>,
    %c0_222 = arith.constant 0 : index
    %c0_223 = arith.constant 0 : index
    %217 = vector.load %arg4[%c0_222, %c0_223] : memref<4x36xf32, #tpu.memory_space<vmem>>, vector<4x36xf32>
    %c0_224 = arith.constant 0 : index
    %c0_225 = arith.constant 0 : index
    %218 = vector.load %arg9[%c0_224, %c0_225] : memref<36x512xf32, #tpu.memory_space<vmem>>, vector<36x512xf32>
    %cst_226 = arith.constant dense<0.000000e+00> : vector<4x512xf32>
    %219 = tpu.matmul %217, %218, %cst_226 {dimension_numbers = #tpu.dot_dimension_numbers<[1], [0], [0], [1], [0, 0, 1, 1], [], []>} : vector<4x36xf32>, vector<36x512xf32>, vector<4x512xf32> -> vector<4x512xf32>
    %cst_227 = arith.constant dense<0.000000e+00> : vector<4xf32>
    %220 = vector.multi_reduction <add>, %219, %cst_227 [1] : vector<4x512xf32> to vector<4xf32>
    %221 = vector.shape_cast %220 : vector<4xf32> to vector<4x1xf32>
    %222 = arith.mulf %219, %219 : vector<4x512xf32>
    %cst_228 = arith.constant dense<0.000000e+00> : vector<4xf32>
    %223 = vector.multi_reduction <add>, %222, %cst_228 [1] : vector<4x512xf32> to vector<4xf32>
    %224 = vector.shape_cast %223 : vector<4xf32> to vector<4x1xf32>
    %cst_229 = arith.constant 0.001953125 : f32
    %225 = vector.broadcast %cst_229 : f32 to vector<4x1xf32>
    %226 = arith.mulf %221, %225 : vector<4x1xf32>
    %cst_230 = arith.constant 0.001953125 : f32
    %227 = vector.broadcast %cst_230 : f32 to vector<4x1xf32>
    %228 = arith.mulf %224, %227 : vector<4x1xf32>
    %229 = arith.mulf %226, %226 : vector<4x1xf32>
    %230 = arith.subf %228, %229 : vector<4x1xf32>
    %c0_231 = arith.constant 0 : index
    %c0_232 = arith.constant 0 : index
    %231 = vector.load %arg5[%c0_231, %c0_232] : memref<4x1xf32, #tpu.memory_space<vmem>>, vector<4x1xf32>
    %cst_233 = arith.constant 9.99999974E-6 : f32
    %232 = vector.broadcast %cst_233 : f32 to vector<4x1xf32>
    %233 = arith.addf %230, %232 : vector<4x1xf32>
    %234 = math.rsqrt %233 : vector<4x1xf32>
    %235 = arith.mulf %231, %234 : vector<4x1xf32>
    %c0_234 = arith.constant 0 : index
    %c0_235 = arith.constant 0 : index
    %236 = vector.load %arg6[%c0_234, %c0_235] : memref<4x1xf32, #tpu.memory_space<vmem>>, vector<4x1xf32>
    %237 = arith.mulf %226, %235 : vector<4x1xf32>
    %238 = arith.subf %236, %237 : vector<4x1xf32>
    %239 = vector.broadcast %235 : vector<4x1xf32> to vector<4x512xf32>
    %240 = arith.mulf %219, %239 : vector<4x512xf32>
    %241 = vector.broadcast %238 : vector<4x1xf32> to vector<4x512xf32>
    %242 = arith.addf %240, %241 : vector<4x512xf32>
    %cst_236 = arith.constant 0.000000e+00 : f32
    %243 = vector.broadcast %cst_236 : f32 to vector<4x512xf32>
    %244 = arith.maximumf %242, %243 : vector<4x512xf32>
    %c0_237 = arith.constant 0 : index
    %c0_238 = arith.constant 0 : index
    %c0_239 = arith.constant 0 : index
    %245 = vector.load %arg0[%c0_237, %c0_238, %c0_239] : memref<2x4x256xf32, #tpu.memory_space<vmem>>, vector<1x4x256xf32>
    %246 = vector.shape_cast %245 : vector<1x4x256xf32> to vector<4x256xf32>
    %247 = vector.extract_strided_slice %244 {offsets = [0, 0], sizes = [4, 256], strides = [1, 1]} : vector<4x512xf32> to vector<4x256xf32>
    %248 = arith.addf %247, %246 : vector<4x256xf32>
    %cst_240 = arith.constant 0.000000e+00 : f32
    %249 = vector.broadcast %cst_240 : f32 to vector<4x256xf32>
    %250 = arith.maximumf %248, %249 : vector<4x256xf32>
    %c0_241 = arith.constant 0 : index
    %c0_242 = arith.constant 0 : index
    %c0_243 = arith.constant 0 : index
    %251 = vector.load %arg7[%c0_241, %c0_242, %c0_243] : memref<2x4x256xf32, #tpu.memory_space<vmem>>, vector<1x4x256xf32>
    %252 = vector.shape_cast %251 : vector<1x4x256xf32> to vector<4x256xf32>
    %253 = vector.shape_cast %250 : vector<4x256xf32> to vector<1x4x256xf32>
    tpu.vector_store %arg7[%c0_241, %c0_242, %c0_243], %253 {strides = array<i32>} : memref<2x4x256xf32, #tpu.memory_space<vmem>>, vector<1x4x256xf32>,
    %c1_244 = arith.constant 1 : index
    %c0_245 = arith.constant 0 : index
    %c0_246 = arith.constant 0 : index
    %254 = vector.load %arg0[%c1_244, %c0_245, %c0_246] : memref<2x4x256xf32, #tpu.memory_space<vmem>>, vector<1x4x256xf32>
    %255 = vector.shape_cast %254 : vector<1x4x256xf32> to vector<4x256xf32>
    %256 = vector.extract_strided_slice %244 {offsets = [0, 256], sizes = [4, 256], strides = [1, 1]} : vector<4x512xf32> to vector<4x256xf32>
    %257 = arith.addf %256, %255 : vector<4x256xf32>
    %cst_247 = arith.constant 0.000000e+00 : f32
    %258 = vector.broadcast %cst_247 : f32 to vector<4x256xf32>
    %259 = arith.maximumf %257, %258 : vector<4x256xf32>
    %c1_248 = arith.constant 1 : index
    %c0_249 = arith.constant 0 : index
    %c0_250 = arith.constant 0 : index
    %260 = vector.load %arg7[%c1_248, %c0_249, %c0_250] : memref<2x4x256xf32, #tpu.memory_space<vmem>>, vector<1x4x256xf32>
    %261 = vector.shape_cast %260 : vector<1x4x256xf32> to vector<4x256xf32>
    %262 = vector.shape_cast %259 : vector<4x256xf32> to vector<1x4x256xf32>
    tpu.vector_store %arg7[%c1_248, %c0_249, %c0_250], %262 {strides = array<i32>} : memref<2x4x256xf32, #tpu.memory_space<vmem>>, vector<1x4x256xf32>,
    return
  }
}

</mosaic_0001>

<bundles_post_ra>
// kernel: tpu_custom_call.1
= control target key start
LH: loop header
LB: loop body
LE: loop exit
PB: predicated region body
PF: predicated region fallthrough
CT: control target
= control target key end

     0   :  { %s1374_s26 = smov 17   ;;  %vm59_vm0 = vcmask 273408   ;;  %v1375_v2 = vmov 0.0   ;;  %s1986_s0 = inlined_call_operand.vmem [shape: f32[2,4,256], index: 0, kind: input, shape index: {}]   ;;  %s1987_s1 = inlined_call_operand.vmem [shape: f32[4,36], index: 1, kind: input, shape index: {}]   ;;  %s1988_s2 = inlined_call_operand.vmem [shape: f32[4,1], index: 2, kind: input, shape index: {}]   ;;  %s1989_s3 = inlined_call_operand.vmem [shape: f32[4,1], index: 3, kind: input, shape index: {}]   ;;  %s1990_s4 = inlined_call_operand.vmem [shape: f32[4,36], index: 4, kind: input, shape index: {}]   ;;  %s1991_s5 = inlined_call_operand.vmem [shape: f32[4,1], index: 5, kind: input, shape index: {}]   ;;  %s1992_s6 = inlined_call_operand.vmem [shape: f32[4,1], index: 6, kind: input, shape index: {}]   ;;  %s1993_s7 = inlined_call_operand.hbm [shape: f32[2,4,256], index: 7, kind: output, shape index: {}]  }
   0x1   :  { %v63_v0 = vld [vmem:[%s1986_s0] sm:$0xff]  ;;  %v64_v1 = vld [vmem:[%s1986_s0 + $0x8] sm:$0xff]  ;;  %58 = vst [vmem:[#allocation2] sm:$0xff] %v1375_v2  ;;  %60 = vst.msk [vmem:[#allocation2 + $0x8] sm:$0xf] %vm59_vm0, %v1375_v2  ;;  %535 = vmatprep.mubr.f32.mxu0 %v1375_v2  ;;  %606 = vmatprep.mubr.f32.mxu1 %v1375_v2 }
   0x2   :  { %67 = vrot.lane.b32.xlu0 %v63_v0, %s1374_s26  ;;  %61 = vst [vmem:[#allocation2 + $0xc] sm:$0xff] %v1375_v2  ;;  %62 = vst.msk [vmem:[#allocation2 + $0x14] sm:$0xf] %vm59_vm0, %v1375_v2 }
   0x3   :  { %12 = vsyncpa [#allocation5], 0  ;;  %v27_v3 = vlaneseq  ;;  %vm80_vm1 = vcmask 1043592   ;;  %vm81_vm2 = vcmask 1047556   ;;  %vm73_vm3 = vcmask 138240   ;;  %s1376_s29 = smov 94  }
   0x4   :  { %vm84_vm4 = vcmask 134144   ;;  %vm1444_vm5 = vmor %vm81_vm2, %vm80_vm1  ;;  %s1377_s30 = smov 110   ;;  %s1378_s8 = smov 96   ;;  %vm237_vm8 = vcmask 777216   ;;  %vm108_vm9 = vcmask 1039360   ;;  %vm255_vm10 = vcmask 769024  }
   0x5   :  { %v1442_v5 = vand.u32 127, %v27_v3  ;;  %s1379_s9 = smov 112   ;;  %s1380_s10 = smov 126   ;;  %vm190_vm13 = vcmask 900096   ;;  %vm126_vm14 = vcmask 1031168   ;;  %vm216_vm15 = vcmask 785408  }
   0x6   :  { %69 = vrot.lane.b32.xlu0 %v64_v1, %s1374_s26  ;;  %s1381_s11 = smov 111   ;;  %s1382_s12 = smov 95   ;;  %vm458_vm0 = vcmask 1043456   ;;  %vm146_vm1 = vcmask 916480   ;;  %vm1994_vm2 = vcmask 908288  }
   0x7   :  { %v1453_v10 = vadd.s32 128, %v1442_v5  ;;  %v34_v12 = vand.u32 15, %v1442_v5  ;;  %s1383_s13 = smov 127   ;;  %v1026_v20 = vld [vmem:[%s1990_s4] sm:$0xf] }
   0x9   :  { %v41_v14 = vand.u32 15, %v1453_v10  ;;  %vm1463_vm6 = vcmp.ne.s32.totalorder %v34_v12, 0  ;;  %vm1608_vm11 = vcmp.ne.s32.totalorder %v34_v12, 15 }
   0xb   :  { %vm1477_vm7 = vcmp.ne.s32.totalorder %v41_v14, 0  ;;  %vm1614_vm12 = vcmp.ne.s32.totalorder %v41_v14, 15 }
  0x74   :  { %v68_v4 = vpop.permute.xlu0 %67 }
  0x75   :  { %v71_v7 = vrot.slane %v68_v4, 4 }
  0x77   :  { %v74_v8 = vsel %vm73_vm3, %v71_v7, %v68_v4  ;;  %85 = vst.msk [vmem:[#allocation2 + $0x8] sm:$0xf] %vm84_vm4, %v71_v7 }
  0x78   :  { %83 = vst.msk [vmem:[#allocation2] sm:$0xff] %vm1444_vm5, %v74_v8  ;;  %v70_v9 = vpop.permute.xlu0 %69 }
  0x79   :  { %v72_v11 = vrot.slane %v70_v9, 4 }
  0x7b   :  { %v75_v13 = vsel %vm73_vm3, %v72_v11, %v70_v9  ;;  %87 = vst.msk [vmem:[#allocation2 + $0x14] sm:$0xf] %vm84_vm4, %v72_v11 }
  0x7c   :  { %86 = vst.msk [vmem:[#allocation2 + $0xc] sm:$0xff] %vm1444_vm5, %v75_v13 }
  0x7e   :  { %v245_v15 = vld [vmem:[#allocation2 + $0x8] sm:$0xf] }
  0x7f   :  { %v180_v16 = vld [vmem:[#allocation2 + $0x8] sm:$0xf]  ;;  %v1467_v18 = vld [vmem:[#allocation2] sm:$0xff]  ;;  %253 = vrot.lane.b32.xlu1 %v245_v15, %s1376_s29 }
  0x80   :  { %188 = vrot.lane.b32.xlu0 %v180_v16, %s1377_s30  ;;  %v1473_v19 = vcombine.high %v1467_v18, %v1467_v18  ;;  %v92_v21 = vsel %vm1463_vm6, %v1467_v18, 0.0  ;;  %v206_v23 = vld [vmem:[#allocation2 + $0x8] sm:$0xf]  ;;  %v229_v41 = vcombine.low %v1467_v18, %v1467_v18 }
  0x81   :  { %94 = vst [vmem:[#allocation3] sm:$0xf] %v92_v21  ;;  %v136_v28 = vld [vmem:[#allocation2 + $0x8] sm:$0xf] }
  0x82   :  { %v415_v22 = vld [vmem:[#allocation2 + $0x14] sm:$0xf]  ;;  %v93_v25 = vsel %vm1477_vm7, %v1473_v19, 0.0  ;;  %v116_v29 = vld [vmem:[#allocation2 + $0x8] sm:$0xf] }
  0x83   :  { %v265_v24 = vld [vmem:[#allocation2 + $0xc] sm:$0xff]  ;;  %423 = vrot.lane.b32.xlu1 %v415_v22, %s1376_s29  ;;  %95 = vst [vmem:[#allocation3 + $0x68] sm:$0xf] %v93_v25  ;;  %v162_v31 = vld [vmem:[#allocation2 + $0x8] sm:$0xf] }
  0x84   :  { %214 = vrot.lane.b32.xlu0 %v206_v23, %s1378_s8  ;;  %v1489_v26 = vcombine.high %v265_v24, %v265_v24  ;;  %v269_v27 = vsel %vm1463_vm6, %v265_v24, 0.0  ;;  %v311_v32 = vld [vmem:[#allocation2 + $0x14] sm:$0xf]  ;;  %v1332_v37 = vld [vmem:[#allocation2 + $0x8] ss:$0 sps:$4 sm:$0xff]   ;;  %v400_v40 = vcombine.low %v265_v24, %v265_v24 }
  0x85   :  { %271 = vst [vmem:[#allocation3 + $0x48] sm:$0xf] %v269_v27  ;;  %v353_v33 = vld [vmem:[#allocation2 + $0x14] sm:$0xf]  ;;  %v1334_v39 = vld [vmem:[#allocation2 + $0x8] ss:$0 sps:$4 sm:$0xff]  }
  0x86   :  { %v270_v30 = vsel %vm1477_vm7, %v1489_v26, 0.0  ;;  %v336_v34 = vld [vmem:[#allocation2 + $0x14] sm:$0xf] }
  0x87   :  { %124 = vrot.lane.b32.xlu1 %v116_v29, %s1380_s10  ;;  %272 = vst [vmem:[#allocation3 + $0x80] sm:$0xf] %v270_v30  ;;  %v378_v35 = vld [vmem:[#allocation2 + $0x14] sm:$0xf] }
  0x88   :  { %144 = vrot.lane.b32.xlu0 %v136_v28, %s1379_s9  ;;  %v292_v36 = vld [vmem:[#allocation2 + $0x14] sm:$0xf] }
  0x89   :  { %v1333_v38 = vld [vmem:[#allocation2 + $0x14] ss:$0 sps:$4 sm:$0xff]  }
  0x8a   :  { %v1337_v42 = vld [vmem:[#allocation2 + $0x14] ss:$0 sps:$4 sm:$0xff]  }
  0x8b   :  { %319 = vrot.lane.b32.xlu1 %v311_v32, %s1379_s9 }
  0x8c   :  { %170 = vrot.lane.b32.xlu0 %v162_v31, %s1381_s11 }
  0x8f   :  { %344 = vrot.lane.b32.xlu1 %v336_v34, %s1381_s11 }
  0x90   :  { %361 = vrot.lane.b32.xlu0 %v353_v33, %s1377_s30 }
  0x93   :  { %184 = vrot.lane.b32.xlu1 %v1467_v18, %s1377_s30 }
  0x94   :  { %386 = vrot.lane.b32.xlu0 %v378_v35, %s1378_s8 }
  0x97   :  { %233 = vrot.lane.b32.xlu1 %v1467_v18, %s1382_s12 }
  0x98   :  { %300 = vrot.lane.b32.xlu0 %v292_v36, %s1380_s10 }
  0x9b   :  { %419 = vrot.lane.b32.xlu1 %v265_v24, %s1376_s29 }
  0x9c   :  { %249 = vrot.lane.b32.xlu0 %v1467_v18, %s1376_s29 }
  0x9f   :  { %120 = vrot.lane.b32.xlu1 %v1467_v18, %s1380_s10 }
  0xa0   :  { %210 = vrot.lane.b32.xlu0 %v1467_v18, %s1378_s8 }
  0xa3   :  { %382 = vrot.lane.b32.xlu1 %v265_v24, %s1378_s8 }
  0xa4   :  { %140 = vrot.lane.b32.xlu0 %v1467_v18, %s1379_s9 }
  0xa7   :  { %104 = vrot.lane.b32.xlu1 %v1467_v18, %s1383_s13 }
  0xa8   :  { %166 = vrot.lane.b32.xlu0 %v1467_v18, %s1381_s11 }
  0xab   :  { %315 = vrot.lane.b32.xlu1 %v265_v24, %s1379_s9 }
  0xac   :  { %357 = vrot.lane.b32.xlu0 %v265_v24, %s1377_s30 }
  0xaf   :  { %340 = vrot.lane.b32.xlu1 %v265_v24, %s1381_s11 }
  0xb0   :  { %404 = vrot.lane.b32.xlu0 %v265_v24, %s1382_s12 }
  0xb3   :  { %281 = vrot.lane.b32.xlu1 %v265_v24, %s1383_s13 }
  0xb4   :  { %296 = vrot.lane.b32.xlu0 %v265_v24, %s1380_s10 }
  0xb7   :  { %406 = vrot.lane.b32.xlu1 %v1333_v38, %s1382_s12 }
  0xb8   :  { %235 = vrot.lane.b32.xlu0 %v1332_v37, %s1382_s12 }
  0xbb   :  { %251 = vrot.lane.b32.xlu1 %v1473_v19, %s1376_s29 }
  0xbc   :  { %106 = vrot.lane.b32.xlu0 %v1334_v39, %s1383_s13 }
  0xbf   :  { %186 = vrot.lane.b32.xlu1 %v1473_v19, %s1377_s30 }
  0xc0   :  { %421 = vrot.lane.b32.xlu0 %v1489_v26, %s1376_s29 }
  0xc3   :  { %212 = vrot.lane.b32.xlu1 %v1473_v19, %s1378_s8 }
  0xc4   :  { %122 = vrot.lane.b32.xlu0 %v1473_v19, %s1380_s10 }
  0xc7   :  { %142 = vrot.lane.b32.xlu1 %v1473_v19, %s1379_s9 }
  0xc8   :  { %317 = vrot.lane.b32.xlu0 %v1489_v26, %s1379_s9 }
  0xcb   :  { %231 = vrot.lane.b32.xlu1 %v229_v41, %s1382_s12 }
  0xcc   :  { %402 = vrot.lane.b32.xlu0 %v400_v40, %s1382_s12 }
  0xcf   :  { %168 = vrot.lane.b32.xlu1 %v1473_v19, %s1381_s11 }
  0xd0   :  { %342 = vrot.lane.b32.xlu0 %v1489_v26, %s1381_s11 }
  0xd3   :  { %359 = vrot.lane.b32.xlu1 %v1489_v26, %s1377_s30 }
  0xd4   :  { %102 = vrot.lane.b32.xlu0 %v229_v41, %s1383_s13 }
  0xd7   :  { %384 = vrot.lane.b32.xlu1 %v1489_v26, %s1378_s8 }
  0xd8   :  { %283 = vrot.lane.b32.xlu0 %v1337_v42, %s1383_s13 }
  0xdb   :  { %298 = vrot.lane.b32.xlu1 %v1489_v26, %s1380_s10 }
  0xdf   :  { %279 = vrot.lane.b32.xlu1 %v400_v40, %s1383_s13 }
  0xf1   :  { %v254_v43 = vpop.permute.xlu1 %253 }
  0xf2   :  { %v189_v44 = vpop.permute.xlu0 %188 }
  0xf5   :  { %v424_v45 = vpop.permute.xlu1 %423 }
  0xf6   :  { %v1562_v46 = vpop.permute.xlu0 %214 }
  0xf9   :  { %v1566_v48 = vpop.permute.xlu1 %124 }
  0xfa   :  { %v1564_v47 = vpop.permute.xlu0 %144 }
  0xfd   :  { %v1570_v50 = vpop.permute.xlu1 %319 }
  0xfe   :  { %v1568_v49 = vpop.permute.xlu0 %170 }
 0x101   :  { %v1574_v52 = vpop.permute.xlu1 %344 }
 0x102   :  { %v1572_v51 = vpop.permute.xlu0 %361 }
 0x105   :  { %v185_v54 = vpop.permute.xlu1 %184 }
 0x106   :  { %v1576_v53 = vpop.permute.xlu0 %386 }
 0x109   :  { %v1580_v56 = vpop.permute.xlu1 %233 }
 0x10a   :  { %v1578_v55 = vpop.permute.xlu0 %300 }
 0x10d   :  { %v420_v58 = vpop.permute.xlu1 %419 }
 0x10e   :  { %v250_v57 = vpop.permute.xlu0 %249 }
 0x111   :  { %v121_v60 = vpop.permute.xlu1 %120 }
 0x112   :  { %v211_v59 = vpop.permute.xlu0 %210 }
 0x115   :  { %v1584_v62 = vpop.permute.xlu1 %382 }
 0x116   :  { %v1582_v61 = vpop.permute.xlu0 %140 }
 0x119   :  { %v1588_v0 = vpop.permute.xlu1 %104 }
 0x11a   :  { %v1586_v63 = vpop.permute.xlu0 %166 }
 0x11d   :  { %v1592_v3 = vpop.permute.xlu1 %315 }
 0x11e   :  { %v1590_v1 = vpop.permute.xlu0 %357 }
 0x121   :  { %v1596_v7 = vpop.permute.xlu1 %340 }
 0x122   :  { %v1594_v4 = vpop.permute.xlu0 %404 }
 0x125   :  { %v1600_v9 = vpop.permute.xlu1 %281 }
 0x126   :  { %v1598_v8 = vpop.permute.xlu0 %296 }
 0x129   :  { %v407_v13 = vpop.permute.xlu1 %406 }
 0x12a   :  { %v236_v11 = vpop.permute.xlu0 %235  ;;  %v409_v16 = vsel %vm237_vm8, %v1594_v4, %v407_v13 }
 0x12b   :  { %v239_v15 = vsel %vm237_vm8, %v1580_v56, %v236_v11  ;;  %413 = vst [vmem:[#allocation3 + $0x88] sm:$0xf0] %v409_v16 }
 0x12c   :  { %243 = vst [vmem:[#allocation3 + $0x70] sm:$0xf0] %v239_v15 }
 0x12d   :  { %v252_v22 = vpop.permute.xlu1 %251 }
 0x12e   :  { %v107_v21 = vpop.permute.xlu0 %106  ;;  %v256_v24 = vsel %vm255_vm10, %v250_v57, %v252_v22  ;;  %v257_v25 = vsel %vm255_vm10, %v252_v22, %v254_v43 }
 0x12f   :  { %v110_v23 = vsel %vm108_vm9, %v1588_v0, %v107_v21  ;;  %v260_v5 = vsel %vm1608_vm11, %v256_v24, 0.0  ;;  %v261_v10 = vsel %vm1614_vm12, %v257_v25, 0.0 }
 0x130   :  { %114 = vst [vmem:[#allocation3 + $0x68] sm:$0xf0] %v110_v23  ;;  %262 = vst [vmem:[#allocation3 + $0x8] sm:$0xf] %v260_v5 }
 0x131   :  { %263 = vst [vmem:[#allocation3 + $0x78] sm:$0xf] %v261_v10  ;;  %v187_v14 = vpop.permute.xlu1 %186 }
 0x132   :  { %v422_v12 = vpop.permute.xlu0 %421  ;;  %v191_v28 = vsel %vm190_vm13, %v185_v54, %v187_v14  ;;  %v192_v29 = vsel %vm190_vm13, %v187_v14, %v189_v44 }
 0x133   :  { %v425_v26 = vsel %vm255_vm10, %v420_v58, %v422_v12  ;;  %v426_v27 = vsel %vm255_vm10, %v422_v12, %v424_v45  ;;  %v195_v32 = vsel %vm1608_vm11, %v191_v28, 0.0  ;;  %v196_v33 = vsel %vm1614_vm12, %v192_v29, 0.0 }
 0x134   :  { %v429_v30 = vsel %vm1608_vm11, %v425_v26, 0.0  ;;  %v430_v31 = vsel %vm1614_vm12, %v426_v27, 0.0  ;;  %v199_v34 = vrot.slane %v195_v32, 4  ;;  %v200_v35 = vrot.slane %v196_v33, 4 }
 0x135   :  { %431 = vst [vmem:[#allocation3 + $0x50] sm:$0xf] %v429_v30  ;;  %432 = vst [vmem:[#allocation3 + $0x90] sm:$0xf] %v430_v31  ;;  %v213_v37 = vpop.permute.xlu1 %212 }
 0x136   :  { %v123_v36 = vpop.permute.xlu0 %122  ;;  %203 = vst [vmem:[#allocation3 + $0x60] sm:$0xf0] %v199_v34  ;;  %204 = vst [vmem:[#allocation3 + $0x38] sm:$0xf0] %v200_v35  ;;  %v217_v40 = vsel %vm216_vm15, %v211_v59, %v213_v37  ;;  %v218_v41 = vsel %vm216_vm15, %v213_v37, %v1562_v46 }
 0x137   :  { %v127_v38 = vsel %vm126_vm14, %v121_v60, %v123_v36  ;;  %v128_v39 = vsel %vm126_vm14, %v123_v36, %v1566_v48  ;;  %v221_v44 = vsel %vm1463_vm6, %v217_v40, 0.0  ;;  %v222_v45 = vsel %vm1477_vm7, %v218_v41, 0.0  ;;  %v450_v46 = vld [vmem:[#allocation3 + $0x8] sm:$0xf] }
 0x138   :  { %v131_v42 = vsel %vm1608_vm11, %v127_v38, 0.0  ;;  %v132_v43 = vsel %vm1614_vm12, %v128_v39, 0.0  ;;  %v451_v54 = vld [vmem:[#allocation3 + $0x78] sm:$0xf]  ;;  %223 = vst [vmem:[#allocation3 + $0x58] sm:$0xf] %v221_v44 }
 0x139   :  { %133 = vst [vmem:[#allocation3 + $0x10] sm:$0xf] %v131_v42  ;;  %134 = vst [vmem:[#allocation3 + $0x28] sm:$0xf] %v132_v43  ;;  %1303 = vmatprep.subr.msk.mxu0 %vm458_vm0, %v451_v54  ;;  %v143_v57 = vpop.permute.xlu1 %142  ;;  %v435_v44 = vld [vmem:[#allocation3 + $0x68] sm:$0xff] }
 0x13a   :  { %224 = vst [vmem:[#allocation3 + $0x70] sm:$0xf] %v222_v45  ;;  %v318_v48 = vpop.permute.xlu0 %317  ;;  %1304 = vmatpush1.msk.msra.mxu0 %vm458_vm0, %v450_v46  ;;  %v147_v60 = vsel %vm146_vm1, %v1582_v61, %v143_v57  ;;  %v148_v11 = vsel %vm146_vm1, %v143_v57, %v1564_v47  ;;  %v433_v54 = vld [vmem:[%s1987_s1] sm:$0xf] }
 0x13b   :  { %v321_v58 = vsel %vm146_vm1, %v1592_v3, %v318_v48  ;;  %v322_v59 = vsel %vm146_vm1, %v318_v48, %v1570_v50  ;;  %v151_v16 = vsel %vm1463_vm6, %v147_v60, 0.0  ;;  %v152_v3 = vsel %vm1477_vm7, %v148_v11, 0.0 }
 0x13c   :  { %v325_v13 = vsel %vm1463_vm6, %v321_v58, 0.0  ;;  %v326_v15 = vsel %vm1477_vm7, %v322_v59, 0.0  ;;  %v453_v21 = vld [vmem:[#allocation3 + $0x90] sm:$0xf]  ;;  %v155_v23 = vrot.slane %v151_v16, 4  ;;  %v156_v61 = vrot.slane %v152_v3, 4 }
 0x13d   :  { %v329_v50 = vrot.slane %v325_v13, 4  ;;  %v330_v22 = vrot.slane %v326_v15, 4  ;;  %1306 = vmatprep.subr.msk.mxu1 %vm458_vm0, %v453_v21  ;;  %v452_v47 = vld [vmem:[#allocation3 + $0x50] sm:$0xf]  ;;  %v232_v25 = vpop.permute.xlu1 %231 }
 0x13e   :  { %v403_v24 = vpop.permute.xlu0 %402  ;;  %1307 = vmatpush1.msk.msra.mxu1 %vm458_vm0, %v452_v47  ;;  %159 = vst [vmem:[#allocation3 + $0x10] sm:$0xf0] %v155_v23  ;;  %160 = vst [vmem:[#allocation3 + $0x28] sm:$0xf0] %v156_v61  ;;  %v238_v10 = vsel %vm237_vm8, %v232_v25, %v1580_v56 }
 0x13f   :  { %333 = vst [vmem:[#allocation3 + $0x18] sm:$0xf0] %v329_v50  ;;  %334 = vst [vmem:[#allocation3 + $0x20] sm:$0xf0] %v330_v22  ;;  %v408_v5 = vsel %vm237_vm8, %v403_v24, %v1594_v4 }
 0x140   :  { %412 = vst [vmem:[#allocation3 + $0x40] sm:$0xf0] %v408_v5  ;;  %242 = vst [vmem:[#allocation3 + $0x58] sm:$0xf0] %v238_v10 }
 0x141   :  { %v447_v12 = vld [vmem:[#allocation3 + $0x70] sm:$0xff]  ;;  %v169_v26 = vpop.permute.xlu1 %168 }
 0x142   :  { %495 = vmatprep.subr.mxu0 %v447_v12  ;;  %v343_v14 = vpop.permute.xlu0 %342  ;;  %v173_v29 = vsel %vm1994_vm2, %v1586_v63, %v169_v26  ;;  %v174_v4 = vsel %vm1994_vm2, %v169_v26, %v1568_v49 }
 0x143   :  { %v346_v27 = vsel %vm1994_vm2, %v1596_v7, %v343_v14  ;;  %v347_v28 = vsel %vm1994_vm2, %v343_v14, %v1574_v52  ;;  %177 = vst [vmem:[#allocation3 + $0x60] sm:$0xf] %v173_v29  ;;  %178 = vst [vmem:[#allocation3 + $0x38] sm:$0xf] %v174_v4  ;;  %vm454_vm2 = vcmask 293888  }
 0x144   :  { %350 = vst [vmem:[#allocation3 + $0x98] sm:$0xf] %v346_v27  ;;  %351 = vst [vmem:[#allocation3 + $0x30] sm:$0xf] %v347_v28 }
 0x145   :  { %v360_v56 = vpop.permute.xlu1 %359 }
 0x146   :  { %v103_v30 = vpop.permute.xlu0 %102  ;;  %v363_v31 = vsel %vm190_vm13, %v1590_v1, %v360_v56  ;;  %v364_v7 = vsel %vm190_vm13, %v360_v56, %v1572_v51 }
 0x147   :  { %v109_v52 = vsel %vm108_vm9, %v103_v30, %v1588_v0  ;;  %v446_v32 = vld [vmem:[#allocation3 + $0x58] sm:$0xff]  ;;  %v367_v63 = vsel %vm1608_vm11, %v363_v31, 0.0  ;;  %v368_v49 = vsel %vm1614_vm12, %v364_v7, 0.0  ;;  %v1384_v31 = vmov 0  }
 0x148   :  { %113 = vst [vmem:[#allocation3] sm:$0xf0] %v109_v52  ;;  %496 = vmatpush1.msra.mxu0 %v446_v32  ;;  %v371_v33 = vrot.slane %v367_v63, 4  ;;  %v372_v34 = vrot.slane %v368_v49, 4  ;;  %1330 = vset.pattern.permute.xlu0 %v1384_v31 }
 0x149   :  { %v385_v35 = vpop.permute.xlu1 %384  ;;  %1331 = vset.pattern.permute.xlu1 %v1384_v31 }
 0x14a   :  { %v284_v36 = vpop.permute.xlu0 %283  ;;  %375 = vst [vmem:[#allocation3 + $0x98] sm:$0xf0] %v371_v33  ;;  %376 = vst [vmem:[#allocation3 + $0x30] sm:$0xf0] %v372_v34  ;;  %v388_v51 = vsel %vm216_vm15, %v1584_v62, %v385_v35  ;;  %v389_v0 = vsel %vm216_vm15, %v385_v35, %v1576_v53  ;;  %v443_v37 = vld [vmem:[#allocation3 + $0x38] sm:$0xff]  ;;  %v442_v38 = vld [vmem:[#allocation3 + $0x60] sm:$0xff] }
 0x14b   :  { %v286_v1 = vsel %vm108_vm9, %v1600_v9, %v284_v36  ;;  %v392_v39 = vsel %vm1463_vm6, %v388_v51, 0.0  ;;  %v393_v40 = vsel %vm1477_vm7, %v389_v0, 0.0  ;;  %497 = vmatprep.subr.mxu0 %v443_v37  ;;  %v439_v62 = vld [vmem:[#allocation3 + $0x28] sm:$0xff]  ;;  %v438_v53 = vld [vmem:[#allocation3 + $0x10] sm:$0xff] }
 0x14c   :  { %290 = vst [vmem:[#allocation3 + $0x80] sm:$0xf0] %v286_v1  ;;  %394 = vst [vmem:[#allocation3 + $0x40] sm:$0xf] %v392_v39  ;;  %498 = vmatpush1.msra.mxu0 %v442_v38  ;;  %v639_v35 = vld [vmem:[%s1988_s2] sm:$0xf] }
 0x14d   :  { %395 = vst [vmem:[#allocation3 + $0x88] sm:$0xf] %v393_v40  ;;  %v299_v41 = vpop.permute.xlu1 %298  ;;  %499 = vmatprep.subr.mxu0 %v439_v62  ;;  %v643_v0 = vld [vmem:[%s1989_s3] sm:$0xf] }
 0x14e   :  { %v302_v42 = vsel %vm126_vm14, %v1598_v8, %v299_v41  ;;  %v303_v43 = vsel %vm126_vm14, %v299_v41, %v1578_v55  ;;  %500 = vmatpush1.msra.mxu0 %v438_v53 }
 0x14f   :  { %v434_v45 = vld [vmem:[#allocation3] sm:$0xff]  ;;  %v306_v46 = vsel %vm1608_vm11, %v302_v42, 0.0  ;;  %v307_v48 = vsel %vm1614_vm12, %v303_v43, 0.0  ;;  %501 = vmatprep.subr.mxu0 %v435_v44 }
 0x150   :  { %308 = vst [vmem:[#allocation3 + $0x18] sm:$0xf] %v306_v46  ;;  %309 = vst [vmem:[#allocation3 + $0x20] sm:$0xf] %v307_v48  ;;  %502 = vmatpush1.msra.mxu0 %v434_v45 }
 0x151   :  { %v280_v8 = vpop.permute.xlu1 %279  ;;  %1305 = vmatmul.mubr.msk.f32.vlgmr.msra.gmra.mxu0 %vm454_vm2, %v433_v54  ;;  %v445_v59 = vld [vmem:[#allocation3 + $0x30] sm:$0xff]  ;;  %v444_v60 = vld [vmem:[#allocation3 + $0x98] sm:$0xff] }
 0x152   :  { %v285_v55 = vsel %vm108_vm9, %v280_v8, %v1600_v9  ;;  %1126 = vmatprep.mubr.f32.mxu0 %v1375_v2 }
 0x153   :  { %289 = vst [vmem:[#allocation3 + $0x48] sm:$0xf0] %v285_v55  ;;  %v448_v58 = vld [vmem:[#allocation3 + $0x40] sm:$0xff] }
 0x154   :  { %v449_v57 = vld [vmem:[#allocation3 + $0x88] sm:$0xff]  ;;  %v437_v15 = vld [vmem:[#allocation3 + $0x80] sm:$0xff] }
 0x155   :  { %566 = vmatprep.subr.mxu1 %v449_v57 }
 0x156   :  { %567 = vmatpush1.msra.mxu1 %v448_v58 }
 0x157   :  { %568 = vmatprep.subr.mxu1 %v445_v59  ;;  %v441_v11 = vld [vmem:[#allocation3 + $0x20] sm:$0xff]  ;;  %v440_v13 = vld [vmem:[#allocation3 + $0x18] sm:$0xff] }
 0x158   :  { %569 = vmatpush1.msra.mxu1 %v444_v60 }
 0x159   :  { %570 = vmatprep.subr.mxu1 %v441_v11 }
 0x15a   :  { %571 = vmatpush1.msra.mxu1 %v440_v13  ;;  %v436_v16 = vld [vmem:[#allocation3 + $0x48] sm:$0xff] }
 0x15b   :  { %572 = vmatprep.subr.mxu1 %v437_v15 }
 0x15c   :  { %573 = vmatpush1.msra.mxu1 %v436_v16 }
 0x15d   :  { %1308 = vmatmul.mubr.msk.f32.vlgmr.msra.gmra.mxu1 %vm454_vm2, %v433_v54 }
 0x15e   :  { %1197 = vmatprep.mubr.f32.mxu1 %v1375_v2 }
 0x211   :  { %v537_v9 = vpop.f32.mrf.mxu0 }
 0x212   :  { %v622_v21 = vmul.f32 %v537_v9, %v537_v9  ;;  %v613_v22 = vsel %vm458_vm0, %v537_v9, 0.0 }
 0x213   :  { %v539_v3 = vpop.f32.mrf.mxu0 }
 0x214   :  { %v623_v50 = vmul.f32 %v539_v3, %v539_v3  ;;  %v614_v23 = vsel %vm458_vm0, %v539_v3, 0.0  ;;  %v626_v61 = vsel %vm458_vm0, %v622_v21, 0.0 }
 0x215   :  { %v615_v24 = vadd.f32 %v614_v23, %v613_v22 }
 0x216   :  { %v627_v47 = vsel %vm458_vm0, %v623_v50, 0.0 }
 0x217   :  { %v628_v2 = vadd.f32 %v627_v47, %v626_v61 }
 0x21d   :  { %v608_v25 = vpop.f32.mrf.mxu1 }
 0x21e   :  { %v616_v5 = vsel %vm458_vm0, %v608_v25, 0.0  ;;  %v624_v10 = vmul.f32 %v608_v25, %v608_v25 }
 0x21f   :  { %v610_v12 = vpop.f32.mrf.mxu1  ;;  %v617_v14 = vadd.f32 %v616_v5, %v615_v24 }
 0x220   :  { %v625_v26 = vmul.f32 %v610_v12, %v610_v12  ;;  %v618_v27 = vsel %vm458_vm0, %v610_v12, 0.0  ;;  %v629_v28 = vsel %vm458_vm0, %v624_v10, 0.0 }
 0x221   :  { %v619_v29 = vadd.f32 %v618_v27, %v617_v14  ;;  %v630_v4 = vadd.f32 %v629_v28, %v628_v2 }
 0x222   :  { %v631_v56 = vsel %vm458_vm0, %v625_v26, 0.0 }
 0x223   :  { %620 = vadd.xlane.f32.xlu0 %v619_v29  ;;  %v632_v30 = vadd.f32 %v631_v56, %v630_v4 }
 0x225   :  { %633 = vadd.xlane.f32.xlu1 %v632_v30 }
 0x2ac   :  { %v621_v7 = vpop.xlane.xlu0 %620 }
 0x2ad   :  { %v635_v52 = vmul.f32 0.001953125, %v621_v7 }
 0x2ae   :  { %v634_v32 = vpop.xlane.xlu1 %633 }
 0x2af   :  { %v637_v63 = vmul.f32 %v635_v52, %v635_v52  ;;  %v636_v49 = vmul.f32 0.001953125, %v634_v32 }
 0x2b1   :  { %v638_v33 = vsub.f32 %v636_v49, %v637_v63 }
 0x2b3   :  { %v640_v34 = vadd.f32 1e-05, %v638_v33 }
 0x2b5   :  { %1348 = vrsqrt.f32 %v640_v34 }
 0x2c2   :  { %v1349_v36 = vpop.eup %1348 }
 0x2c3   :  { %v642_v51 = vmul.f32 %v1349_v36, %v639_v35 }
 0x2c5   :  { %648 = vperm.xlu0 %1330, %v642_v51   ;;  %v644_v1 = vmul.f32 %v642_v51, %v635_v52 }
 0x2c7   :  { %v645_v37 = vsub.f32 %v643_v0, %v644_v1 }
 0x2c9   :  { %657 = vperm.xlu1 %1331, %v645_v37  }
 0x340   :  { %v649_v38 = vpop.permute.xlu0 %648 }
 0x341   :  { %v651_v39 = vmul.f32 %v649_v38, %v537_v9  ;;  %v652_v40 = vmul.f32 %v649_v38, %v539_v3  ;;  %v653_v62 = vmul.f32 %v649_v38, %v608_v25  ;;  %v654_v41 = vmul.f32 %v649_v38, %v610_v12 }
 0x344   :  { %v658_v53 = vpop.permute.xlu1 %657 }
 0x345   :  { %v660_v42 = vadd.f32 %v658_v53, %v651_v39  ;;  %v661_v43 = vadd.f32 %v658_v53, %v652_v40  ;;  %v662_v44 = vadd.f32 %v658_v53, %v653_v62  ;;  %v663_v45 = vadd.f32 %v658_v53, %v654_v41 }
 0x347   :  { %v664_v54 = vmax.f32 %v660_v42, 0.0  ;;  %v665_v46 = vmax.f32 %v661_v43, 0.0  ;;  %v666_v8 = vmax.f32 %v662_v44, 0.0  ;;  %v667_v55 = vmax.f32 %v663_v45, 0.0 }
 0x349   :  { %v670_v48 = vcombine.low %v664_v54, %v665_v46  ;;  %v681_v57 = vcombine.low %v666_v8, %v667_v55 }
 0x34b   :  { %671 = vrot.lane.b32.xlu1 %v670_v48, %s1374_s26 }
 0x34f   :  { %682 = vrot.lane.b32.xlu1 %v681_v57, %s1374_s26 }
 0x3bd   :  { %v672_v58 = vpop.permute.xlu1 %671 }
 0x3be   :  { %v673_v59 = vrot.slane %v672_v58, 4 }
 0x3c0   :  { %v674_v60 = vsel %vm73_vm3, %v673_v59, %v672_v58  ;;  %678 = vst.msk [vmem:[#allocation2 + $0x8] sm:$0xf] %vm84_vm4, %v673_v59 }
 0x3c1   :  { %677 = vst.msk [vmem:[#allocation2] sm:$0xff] %vm1444_vm5, %v674_v60  ;;  %v683_v11 = vpop.permute.xlu1 %682 }
 0x3c2   :  { %v684_v13 = vrot.slane %v683_v11, 4 }
 0x3c4   :  { %v685_v15 = vsel %vm73_vm3, %v684_v13, %v683_v11  ;;  %689 = vst.msk [vmem:[#allocation2 + $0x14] sm:$0xf] %vm84_vm4, %v684_v13  ;;  %vm2005_vm3 = vcmask 908288  }
 0x3c5   :  { %688 = vst.msk [vmem:[#allocation2 + $0xc] sm:$0xff] %vm1444_vm5, %v685_v15  ;;  %vm2006_vm4 = vmmov %vm2005_vm3 }
 0x3c6   :  { %vm2007_vm5 = vmmov %vm2005_vm3 }
 0x3c7   :  { %v840_v16 = vld [vmem:[#allocation2 + $0x8] sm:$0xf] }
 0x3c8   :  { %v778_v9 = vld [vmem:[#allocation2 + $0x8] sm:$0xf]  ;;  %848 = vrot.lane.b32.xlu1 %v840_v16, %s1376_s29  ;;  %v1747_v3 = vld [vmem:[#allocation2] sm:$0xff] }
 0x3c9   :  { %786 = vrot.lane.b32.xlu0 %v778_v9, %s1377_s30  ;;  %v1751_v21 = vcombine.high %v1747_v3, %v1747_v3  ;;  %v694_v50 = vsel %vm1463_vm6, %v1747_v3, 0.0  ;;  %v803_v22 = vld [vmem:[#allocation2 + $0x8] sm:$0xf]  ;;  %v825_v31 = vcombine.low %v1747_v3, %v1747_v3 }
 0x3ca   :  { %696 = vst [vmem:[#allocation3] sm:$0xf] %v694_v50  ;;  %v736_v25 = vld [vmem:[#allocation2 + $0x8] sm:$0xf] }
 0x3cb   :  { %v1008_v23 = vld [vmem:[#allocation2 + $0x14] sm:$0xf]  ;;  %v695_v61 = vsel %vm1477_vm7, %v1751_v21, 0.0  ;;  %v717_v5 = vld [vmem:[#allocation2 + $0x8] sm:$0xf] }
 0x3cc   :  { %1016 = vrot.lane.b32.xlu1 %v1008_v23, %s1376_s29  ;;  %v1007_v6 = vld [vmem:[#allocation2 + $0xc] sm:$0xff]  ;;  %697 = vst [vmem:[#allocation3 + $0x68] sm:$0xf] %v695_v61  ;;  %v761_v12 = vld [vmem:[#allocation2 + $0x8] sm:$0xf] }
 0x3cd   :  { %811 = vrot.lane.b32.xlu0 %v803_v22, %s1378_s8  ;;  %v1011_v47 = vcombine.high %v1007_v6, %v1007_v6  ;;  %v862_v24 = vsel %vm1463_vm6, %v1007_v6, 0.0  ;;  %v904_v14 = vld [vmem:[#allocation2 + $0x14] sm:$0xf]  ;;  %v1342_v29 = vld [vmem:[#allocation2 + $0x8] ss:$0 sps:$4 sm:$0xff]   ;;  %v993_v30 = vcombine.low %v1007_v6, %v1007_v6 }
 0x3ce   :  { %864 = vst [vmem:[#allocation3 + $0x48] sm:$0xf] %v862_v24  ;;  %v946_v2 = vld [vmem:[#allocation2 + $0x14] sm:$0xf]  ;;  %v1343_v4 = vld [vmem:[#allocation2 + $0x8] ss:$0 sps:$4 sm:$0xff]  }
 0x3cf   :  { %v863_v10 = vsel %vm1477_vm7, %v1011_v47, 0.0  ;;  %v929_v26 = vld [vmem:[#allocation2 + $0x14] sm:$0xf] }
 0x3d0   :  { %725 = vrot.lane.b32.xlu1 %v717_v5, %s1380_s10  ;;  %865 = vst [vmem:[#allocation3 + $0x80] sm:$0xf] %v863_v10  ;;  %v971_v27 = vld [vmem:[#allocation2 + $0x14] sm:$0xf] }
 0x3d1   :  { %744 = vrot.lane.b32.xlu0 %v736_v25, %s1379_s9  ;;  %v885_v28 = vld [vmem:[#allocation2 + $0x14] sm:$0xf] }
 0x3d2   :  { %v1344_v56 = vld [vmem:[#allocation2 + $0x14] ss:$0 sps:$4 sm:$0xff]  }
 0x3d3   :  { %v1345_v7 = vld [vmem:[#allocation2 + $0x14] ss:$0 sps:$4 sm:$0xff]  }
 0x3d4   :  { %912 = vrot.lane.b32.xlu1 %v904_v14, %s1379_s9 }
 0x3d5   :  { %769 = vrot.lane.b32.xlu0 %v761_v12, %s1381_s11 }
 0x3d8   :  { %937 = vrot.lane.b32.xlu1 %v929_v26, %s1381_s11 }
 0x3d9   :  { %954 = vrot.lane.b32.xlu0 %v946_v2, %s1377_s30 }
 0x3dc   :  { %844 = vrot.lane.b32.xlu1 %v1747_v3, %s1376_s29 }
 0x3dd   :  { %979 = vrot.lane.b32.xlu0 %v971_v27, %s1378_s8 }
 0x3e0   :  { %782 = vrot.lane.b32.xlu1 %v1747_v3, %s1377_s30 }
 0x3e1   :  { %893 = vrot.lane.b32.xlu0 %v885_v28, %s1380_s10 }
 0x3e4   :  { %829 = vrot.lane.b32.xlu1 %v1747_v3, %s1382_s12 }
 0x3e5   :  { %807 = vrot.lane.b32.xlu0 %v1747_v3, %s1378_s8 }
 0x3e8   :  { %1012 = vrot.lane.b32.xlu1 %v1007_v6, %s1376_s29 }
 0x3e9   :  { %740 = vrot.lane.b32.xlu0 %v1747_v3, %s1379_s9 }
 0x3ec   :  { %721 = vrot.lane.b32.xlu1 %v1747_v3, %s1380_s10 }
 0x3ed   :  { %765 = vrot.lane.b32.xlu0 %v1747_v3, %s1381_s11 }
 0x3f0   :  { %975 = vrot.lane.b32.xlu1 %v1007_v6, %s1378_s8 }
 0x3f1   :  { %950 = vrot.lane.b32.xlu0 %v1007_v6, %s1377_s30 }
 0x3f4   :  { %706 = vrot.lane.b32.xlu1 %v1747_v3, %s1383_s13 }
 0x3f5   :  { %997 = vrot.lane.b32.xlu0 %v1007_v6, %s1382_s12 }
 0x3f8   :  { %908 = vrot.lane.b32.xlu1 %v1007_v6, %s1379_s9 }
 0x3f9   :  { %889 = vrot.lane.b32.xlu0 %v1007_v6, %s1380_s10 }
 0x3fc   :  { %933 = vrot.lane.b32.xlu1 %v1007_v6, %s1381_s11 }
 0x3fd   :  { %831 = vrot.lane.b32.xlu0 %v1342_v29, %s1382_s12 }
 0x400   :  { %874 = vrot.lane.b32.xlu1 %v1007_v6, %s1383_s13 }
 0x401   :  { %708 = vrot.lane.b32.xlu0 %v1343_v4, %s1383_s13 }
 0x404   :  { %999 = vrot.lane.b32.xlu1 %v1344_v56, %s1382_s12 }
 0x405   :  { %1014 = vrot.lane.b32.xlu0 %v1011_v47, %s1376_s29 }
 0x408   :  { %846 = vrot.lane.b32.xlu1 %v1751_v21, %s1376_s29 }
 0x409   :  { %723 = vrot.lane.b32.xlu0 %v1751_v21, %s1380_s10 }
 0x40c   :  { %784 = vrot.lane.b32.xlu1 %v1751_v21, %s1377_s30 }
 0x40d   :  { %910 = vrot.lane.b32.xlu0 %v1011_v47, %s1379_s9 }
 0x410   :  { %809 = vrot.lane.b32.xlu1 %v1751_v21, %s1378_s8 }
 0x411   :  { %995 = vrot.lane.b32.xlu0 %v993_v30, %s1382_s12 }
 0x414   :  { %742 = vrot.lane.b32.xlu1 %v1751_v21, %s1379_s9 }
 0x415   :  { %935 = vrot.lane.b32.xlu0 %v1011_v47, %s1381_s11 }
 0x418   :  { %827 = vrot.lane.b32.xlu1 %v825_v31, %s1382_s12 }
 0x419   :  { %704 = vrot.lane.b32.xlu0 %v825_v31, %s1383_s13 }
 0x41c   :  { %767 = vrot.lane.b32.xlu1 %v1751_v21, %s1381_s11 }
 0x41d   :  { %876 = vrot.lane.b32.xlu0 %v1345_v7, %s1383_s13 }
 0x420   :  { %952 = vrot.lane.b32.xlu1 %v1011_v47, %s1377_s30 }
 0x424   :  { %977 = vrot.lane.b32.xlu1 %v1011_v47, %s1378_s8 }
 0x428   :  { %891 = vrot.lane.b32.xlu1 %v1011_v47, %s1380_s10 }
 0x42c   :  { %872 = vrot.lane.b32.xlu1 %v993_v30, %s1383_s13 }
 0x43a   :  { %v849_v32 = vpop.permute.xlu1 %848 }
 0x43b   :  { %v1825_v52 = vpop.permute.xlu0 %786 }
 0x43e   :  { %v1017_v49 = vpop.permute.xlu1 %1016 }
 0x43f   :  { %v1827_v63 = vpop.permute.xlu0 %811 }
 0x442   :  { %v726_v34 = vpop.permute.xlu1 %725 }
 0x443   :  { %v1829_v33 = vpop.permute.xlu0 %744 }
 0x446   :  { %v913_v36 = vpop.permute.xlu1 %912 }
 0x447   :  { %v1831_v35 = vpop.permute.xlu0 %769 }
 0x44a   :  { %v1835_v0 = vpop.permute.xlu1 %937 }
 0x44b   :  { %v1833_v51 = vpop.permute.xlu0 %954 }
 0x44e   :  { %v845_v37 = vpop.permute.xlu1 %844 }
 0x44f   :  { %v1837_v1 = vpop.permute.xlu0 %979 }
 0x452   :  { %v783_v39 = vpop.permute.xlu1 %782 }
 0x453   :  { %v1839_v38 = vpop.permute.xlu0 %893 }
 0x456   :  { %v1843_v62 = vpop.permute.xlu1 %829 }
 0x457   :  { %v1841_v40 = vpop.permute.xlu0 %807 }
 0x45a   :  { %v1013_v53 = vpop.permute.xlu1 %1012 }
 0x45b   :  { %v1845_v41 = vpop.permute.xlu0 %740 }
 0x45e   :  { %v722_v43 = vpop.permute.xlu1 %721 }
 0x45f   :  { %v1847_v42 = vpop.permute.xlu0 %765 }
 0x462   :  { %v1851_v45 = vpop.permute.xlu1 %975 }
 0x463   :  { %v1849_v44 = vpop.permute.xlu0 %950 }
 0x466   :  { %v1853_v46 = vpop.permute.xlu1 %706 }
 0x467   :  { %v998_v54 = vpop.permute.xlu0 %997 }
 0x46a   :  { %v909_v8 = vpop.permute.xlu1 %908 }
 0x46b   :  { %v1855_v48 = vpop.permute.xlu0 %889 }
 0x46e   :  { %v1857_v57 = vpop.permute.xlu1 %933 }
 0x46f   :  { %v832_v55 = vpop.permute.xlu0 %831 }
 0x470   :  { %v834_v58 = vsel %vm237_vm8, %v1843_v62, %v832_v55 }
 0x471   :  { %838 = vst [vmem:[#allocation3 + $0x70] sm:$0xf0] %v834_v58 }
 0x472   :  { %v1861_v60 = vpop.permute.xlu1 %874 }
 0x473   :  { %v709_v59 = vpop.permute.xlu0 %708 }
 0x474   :  { %v711_v11 = vsel %vm108_vm9, %v1853_v46, %v709_v59 }
 0x475   :  { %715 = vst [vmem:[#allocation3 + $0x68] sm:$0xf0] %v711_v11 }
 0x476   :  { %v1000_v15 = vpop.permute.xlu1 %999 }
 0x477   :  { %v1015_v13 = vpop.permute.xlu0 %1014  ;;  %v1002_v3 = vsel %vm237_vm8, %v998_v54, %v1000_v15 }
 0x478   :  { %v1018_v16 = vsel %vm255_vm10, %v1013_v53, %v1015_v13  ;;  %v1019_v9 = vsel %vm255_vm10, %v1015_v13, %v1017_v49  ;;  %1006 = vst [vmem:[#allocation3 + $0x88] sm:$0xf0] %v1002_v3 }
 0x479   :  { %v1022_v21 = vsel %vm1608_vm11, %v1018_v16, 0.0  ;;  %v1023_v50 = vsel %vm1614_vm12, %v1019_v9, 0.0 }
 0x47a   :  { %1024 = vst [vmem:[#allocation3 + $0x50] sm:$0xf] %v1022_v21  ;;  %1025 = vst [vmem:[#allocation3 + $0x90] sm:$0xf] %v1023_v50  ;;  %v847_v23 = vpop.permute.xlu1 %846 }
 0x47b   :  { %v724_v22 = vpop.permute.xlu0 %723  ;;  %v850_v47 = vsel %vm255_vm10, %v845_v37, %v847_v23  ;;  %v851_v24 = vsel %vm255_vm10, %v847_v23, %v849_v32  ;;  %vm2008_vm10 = vmmov %vm2005_vm3 }
 0x47c   :  { %v727_v6 = vsel %vm126_vm14, %v722_v43, %v724_v22  ;;  %v728_v61 = vsel %vm126_vm14, %v724_v22, %v726_v34  ;;  %v854_v10 = vsel %vm1608_vm11, %v850_v47, 0.0  ;;  %v855_v12 = vsel %vm1614_vm12, %v851_v24, 0.0  ;;  %v1028_v17 = vld [vmem:[#allocation3 + $0x68] sm:$0xff] }
 0x47d   :  { %v731_v25 = vsel %vm1608_vm11, %v727_v6, 0.0  ;;  %v732_v5 = vsel %vm1614_vm12, %v728_v61, 0.0  ;;  %856 = vst [vmem:[#allocation3 + $0x8] sm:$0xf] %v854_v10  ;;  %857 = vst [vmem:[#allocation3 + $0x78] sm:$0xf] %v855_v12 }
 0x47e   :  { %733 = vst [vmem:[#allocation3 + $0x10] sm:$0xf] %v731_v25  ;;  %734 = vst [vmem:[#allocation3 + $0x28] sm:$0xf] %v732_v5  ;;  %v785_v2 = vpop.permute.xlu1 %784 }
 0x47f   :  { %v911_v14 = vpop.permute.xlu0 %910  ;;  %v788_v28 = vsel %vm190_vm13, %v783_v39, %v785_v2  ;;  %v789_v29 = vsel %vm190_vm13, %v785_v2, %v1825_v52 }
 0x480   :  { %v914_v26 = vsel %vm146_vm1, %v909_v8, %v911_v14  ;;  %v915_v27 = vsel %vm146_vm1, %v911_v14, %v913_v36  ;;  %v792_v30 = vsel %vm1608_vm11, %v788_v28, 0.0  ;;  %v793_v31 = vsel %vm1614_vm12, %v789_v29, 0.0 }
 0x481   :  { %v918_v4 = vsel %vm1463_vm6, %v914_v26, 0.0  ;;  %v919_v56 = vsel %vm1477_vm7, %v915_v27, 0.0  ;;  %v1046_v7 = vld [vmem:[#allocation3 + $0x90] sm:$0xf]  ;;  %v796_v34 = vrot.slane %v792_v30, 4  ;;  %v797_v36 = vrot.slane %v793_v31, 4 }
 0x482   :  { %v922_v32 = vrot.slane %v918_v4, 4  ;;  %v923_v49 = vrot.slane %v919_v56, 4  ;;  %1312 = vmatprep.subr.msk.mxu1 %vm458_vm0, %v1046_v7  ;;  %v1045_v52 = vld [vmem:[#allocation3 + $0x50] sm:$0xf]  ;;  %v810_v39 = vpop.permute.xlu1 %809 }
 0x483   :  { %v996_v37 = vpop.permute.xlu0 %995  ;;  %1313 = vmatpush1.msk.msra.mxu1 %vm458_vm0, %v1045_v52  ;;  %800 = vst [vmem:[#allocation3 + $0x60] sm:$0xf0] %v796_v34  ;;  %801 = vst [vmem:[#allocation3 + $0x38] sm:$0xf0] %v797_v36  ;;  %v813_v43 = vsel %vm216_vm15, %v1841_v40, %v810_v39  ;;  %v814_v8 = vsel %vm216_vm15, %v810_v39, %v1827_v63 }
 0x484   :  { %926 = vst [vmem:[#allocation3 + $0x18] sm:$0xf0] %v922_v32  ;;  %927 = vst [vmem:[#allocation3 + $0x20] sm:$0xf0] %v923_v49  ;;  %v1001_v53 = vsel %vm237_vm8, %v996_v37, %v998_v54  ;;  %v817_v55 = vsel %vm1463_vm6, %v813_v43, 0.0  ;;  %v818_v58 = vsel %vm1477_vm7, %v814_v8, 0.0 }
 0x485   :  { %1005 = vst [vmem:[#allocation3 + $0x40] sm:$0xf0] %v1001_v53  ;;  %v1044_v59 = vld [vmem:[#allocation3 + $0x78] sm:$0xf]  ;;  %v1043_v11 = vld [vmem:[#allocation3 + $0x8] sm:$0xf] }
 0x486   :  { %819 = vst [vmem:[#allocation3 + $0x58] sm:$0xf] %v817_v55  ;;  %820 = vst [vmem:[#allocation3 + $0x70] sm:$0xf] %v818_v58  ;;  %1309 = vmatprep.subr.msk.mxu0 %vm458_vm0, %v1044_v59  ;;  %v743_v40 = vpop.permute.xlu1 %742 }
 0x487   :  { %v936_v54 = vpop.permute.xlu0 %935  ;;  %1310 = vmatpush1.msk.msra.mxu0 %vm458_vm0, %v1043_v11  ;;  %v746_v15 = vsel %vm146_vm1, %v1845_v41, %v743_v40  ;;  %v747_v16 = vsel %vm146_vm1, %v743_v40, %v1829_v33 }
 0x488   :  { %v939_v63 = vsel %vm2005_vm3, %v1857_v57, %v936_v54  ;;  %v940_v13 = vsel %vm2006_vm4, %v936_v54, %v1835_v0  ;;  %v750_v9 = vsel %vm1463_vm6, %v746_v15, 0.0  ;;  %v751_v3 = vsel %vm1477_vm7, %v747_v16, 0.0 }
 0x489   :  { %943 = vst [vmem:[#allocation3 + $0x98] sm:$0xf] %v939_v63  ;;  %944 = vst [vmem:[#allocation3 + $0x30] sm:$0xf] %v940_v13  ;;  %v754_v21 = vrot.slane %v750_v9, 4  ;;  %v755_v50 = vrot.slane %v751_v3, 4 }
 0x48a   :  { %v828_v22 = vpop.permute.xlu1 %827 }
 0x48b   :  { %v705_v57 = vpop.permute.xlu0 %704  ;;  %758 = vst [vmem:[#allocation3 + $0x10] sm:$0xf0] %v754_v21  ;;  %759 = vst [vmem:[#allocation3 + $0x28] sm:$0xf0] %v755_v50  ;;  %v833_v33 = vsel %vm237_vm8, %v828_v22, %v1843_v62 }
 0x48c   :  { %v710_v0 = vsel %vm108_vm9, %v705_v57, %v1853_v46  ;;  %837 = vst [vmem:[#allocation3 + $0x58] sm:$0xf0] %v833_v33 }
 0x48d   :  { %714 = vst [vmem:[#allocation3] sm:$0xf0] %v710_v0  ;;  %v1040_v41 = vld [vmem:[#allocation3 + $0x70] sm:$0xff] }
 0x48e   :  { %1086 = vmatprep.subr.mxu0 %v1040_v41  ;;  %v768_v6 = vpop.permute.xlu1 %767 }
 0x48f   :  { %v877_v23 = vpop.permute.xlu0 %876  ;;  %v771_v47 = vsel %vm2007_vm5, %v1847_v42, %v768_v6  ;;  %v772_v24 = vsel %vm2008_vm10, %v768_v6, %v1831_v35 }
 0x490   :  { %v879_v61 = vsel %vm108_vm9, %v1861_v60, %v877_v23  ;;  %775 = vst [vmem:[#allocation3 + $0x60] sm:$0xf] %v771_v47  ;;  %776 = vst [vmem:[#allocation3 + $0x38] sm:$0xf] %v772_v24 }
 0x491   :  { %883 = vst [vmem:[#allocation3 + $0x80] sm:$0xf0] %v879_v61 }
 0x492   :  { %v953_v46 = vpop.permute.xlu1 %952  ;;  %v1032_v29 = vld [vmem:[#allocation3 + $0x28] sm:$0xff]  ;;  %v1031_v56 = vld [vmem:[#allocation3 + $0x10] sm:$0xff] }
 0x493   :  { %v956_v62 = vsel %vm190_vm13, %v1849_v44, %v953_v46  ;;  %v957_v25 = vsel %vm190_vm13, %v953_v46, %v1833_v51  ;;  %v1039_v5 = vld [vmem:[#allocation3 + $0x58] sm:$0xff]  ;;  %v1230_v46 = vld [vmem:[%s1991_s5] sm:$0xf] }
 0x494   :  { %v960_v10 = vsel %vm1608_vm11, %v956_v62, 0.0  ;;  %v961_v42 = vsel %vm1614_vm12, %v957_v25, 0.0  ;;  %1087 = vmatpush1.msra.mxu0 %v1039_v5  ;;  %v1027_v7 = vld [vmem:[#allocation3] sm:$0xff]  ;;  %v1234_v5 = vld [vmem:[%s1992_s6] sm:$0xf] }
 0x495   :  { %v964_v12 = vrot.slane %v960_v10, 4  ;;  %v965_v35 = vrot.slane %v961_v42, 4 }
 0x496   :  { %v978_v14 = vpop.permute.xlu1 %977 }
 0x497   :  { %968 = vst [vmem:[#allocation3 + $0x98] sm:$0xf0] %v964_v12  ;;  %969 = vst [vmem:[#allocation3 + $0x30] sm:$0xf0] %v965_v35  ;;  %v981_v2 = vsel %vm216_vm15, %v1851_v45, %v978_v14  ;;  %v982_v44 = vsel %vm216_vm15, %v978_v14, %v1837_v1  ;;  %v1036_v51 = vld [vmem:[#allocation3 + $0x38] sm:$0xff]  ;;  %v1035_v26 = vld [vmem:[#allocation3 + $0x60] sm:$0xff] }
 0x498   :  { %v985_v27 = vsel %vm1463_vm6, %v981_v2, 0.0  ;;  %v986_v28 = vsel %vm1477_vm7, %v982_v44, 0.0  ;;  %1088 = vmatprep.subr.mxu0 %v1036_v51  ;;  %v1030_v52 = vld [vmem:[#allocation3 + $0x80] sm:$0xff]  ;;  %v1259_v35 = vld [vmem:[%s1986_s0] sm:$0xff]  ;;  %v1315_v14 = vld [vmem:[%s1986_s0 + $0x8] sm:$0xff]  ;;  %s1385_s0 = smov [#allocation4]  }
 0x499   :  { %987 = vst [vmem:[#allocation3 + $0x40] sm:$0xf] %v985_v27  ;;  %988 = vst [vmem:[#allocation3 + $0x88] sm:$0xf] %v986_v28  ;;  %1089 = vmatpush1.msra.mxu0 %v1035_v26  ;;  %v1261_v27 = vcombine.high %v1259_v35, %v1259_v35  ;;  %v1275_v28 = vcombine.high %v1315_v14, %v1315_v14  ;;  %s1292_s5 = sshll.u32 %s1385_s0, 4  ;;  %s1293_s5 = int_to_ptr.vmem [resolvable:$true] %s1292_s5 }
 0x49a   :  { %1090 = vmatprep.subr.mxu0 %v1032_v29  ;;  %v892_v4 = vpop.permute.xlu1 %891  ;;  %s1352_s6 = scalar_lea.vmem %s1293_s5, 256  ;;  %p1357_p1 = scmp.lt.s32.totalorder %s1293_s5, %s1293_s5 }
 0x49b   :  { %v895_v45 = vsel %vm126_vm14, %v1855_v48, %v892_v4  ;;  %v896_v1 = vsel %vm126_vm14, %v892_v4, %v1839_v38  ;;  %1091 = vmatpush1.msra.mxu0 %v1031_v56  ;;  %p1353_p0 = scmp.ne.s32.totalorder %s1293_s5, %s1352_s6  ;;  %p1358_p2 = scmp.lt.s32.totalorder %s1352_s6, %s1352_s6 }
 0x49c   :  { %v899_v30 = vsel %vm1608_vm11, %v895_v45, 0.0  ;;  %v900_v31 = vsel %vm1614_vm12, %v896_v1, 0.0  ;;  %1092 = vmatprep.subr.mxu0 %v1028_v17 }
 0x49d   :  { %901 = vst [vmem:[#allocation3 + $0x18] sm:$0xf] %v899_v30  ;;  %902 = vst [vmem:[#allocation3 + $0x20] sm:$0xf] %v900_v31  ;;  %1093 = vmatpush1.msra.mxu0 %v1027_v7  ;;  %p1359_p3 = por %p1358_p2, %p1357_p1 }
 0x49e   :  { %v873_v48 = vpop.permute.xlu1 %872  ;;  %1311 = vmatmul.mubr.msk.f32.vlgmr.msra.gmra.mxu0 %vm454_vm2, %v1026_v20  ;;  %v1038_v18 = vld [vmem:[#allocation3 + $0x30] sm:$0xff]  ;;  %v1037_v19 = vld [vmem:[#allocation3 + $0x98] sm:$0xff] }
 0x49f   :  { %v878_v38 = vsel %vm108_vm9, %v873_v48, %v1861_v60  ;;  %p1360_p4 = pnand %p1359_p3, %p1353_p0 }
 0x4a0   :  { %882 = vst [vmem:[#allocation3 + $0x48] sm:$0xf0] %v878_v38  ;;  %v1042_v32 = vld [vmem:[#allocation3 + $0x88] sm:$0xff]  ;;  %v1041_v49 = vld [vmem:[#allocation3 + $0x40] sm:$0xff] }
 0x4a1   :  { %1157 = vmatprep.subr.mxu1 %v1042_v32 }
 0x4a2   :  { %1158 = vmatpush1.msra.mxu1 %v1041_v49 }
 0x4a3   :  { %1159 = vmatprep.subr.mxu1 %v1038_v18 }
 0x4a4   :  { %1160 = vmatpush1.msra.mxu1 %v1037_v19  ;;  %v1034_v34 = vld [vmem:[#allocation3 + $0x20] sm:$0xff]  ;;  %v1033_v36 = vld [vmem:[#allocation3 + $0x18] sm:$0xff] }
 0x4a5   :  { %1161 = vmatprep.subr.mxu1 %v1034_v34 }
 0x4a6   :  { %1162 = vmatpush1.msra.mxu1 %v1033_v36 }
 0x4a7   :  { %1163 = vmatprep.subr.mxu1 %v1030_v52  ;;  %v1029_v37 = vld [vmem:[#allocation3 + $0x48] sm:$0xff] }
 0x4a8   :  { %1164 = vmatpush1.msra.mxu1 %v1029_v37 }
 0x4a9   :  { %1314 = vmatmul.mubr.msk.f32.vlgmr.msra.gmra.mxu1 %vm454_vm2, %v1026_v20 }
 0x55e   :  { %v1128_v60 = vpop.f32.mrf.mxu0 }
 0x55f   :  { %v1213_v53 = vmul.f32 %v1128_v60, %v1128_v60  ;;  %v1204_v8 = vsel %vm458_vm0, %v1128_v60, 0.0 }
 0x560   :  { %v1130_v39 = vpop.f32.mrf.mxu0 }
 0x561   :  { %v1214_v43 = vmul.f32 %v1130_v39, %v1130_v39  ;;  %v1205_v55 = vsel %vm458_vm0, %v1130_v39, 0.0  ;;  %v1217_v58 = vsel %vm458_vm0, %v1213_v53, 0.0 }
 0x562   :  { %v1206_v11 = vadd.f32 %v1205_v55, %v1204_v8 }
 0x563   :  { %v1218_v59 = vsel %vm458_vm0, %v1214_v43, 0.0 }
 0x564   :  { %v1219_v13 = vadd.f32 %v1218_v59, %v1217_v58 }
 0x569   :  { %v1199_v54 = vpop.f32.mrf.mxu1 }
 0x56a   :  { %v1207_v40 = vsel %vm458_vm0, %v1199_v54, 0.0  ;;  %v1215_v63 = vmul.f32 %v1199_v54, %v1199_v54 }
 0x56b   :  { %v1208_v15 = vadd.f32 %v1207_v40, %v1206_v11  ;;  %v1201_v16 = vpop.f32.mrf.mxu1 }
 0x56c   :  { %v1220_v9 = vsel %vm458_vm0, %v1215_v63, 0.0  ;;  %v1209_v3 = vsel %vm458_vm0, %v1201_v16, 0.0  ;;  %v1216_v21 = vmul.f32 %v1201_v16, %v1201_v16 }
 0x56d   :  { %v1210_v50 = vadd.f32 %v1209_v3, %v1208_v15  ;;  %v1221_v57 = vadd.f32 %v1220_v9, %v1219_v13 }
 0x56e   :  { %v1222_v22 = vsel %vm458_vm0, %v1216_v21, 0.0 }
 0x56f   :  { %1211 = vadd.xlane.f32.xlu0 %v1210_v50  ;;  %v1223_v0 = vadd.f32 %v1222_v22, %v1221_v57 }
 0x571   :  { %1224 = vadd.xlane.f32.xlu1 %v1223_v0 }
 0x5f8   :  { %v1212_v33 = vpop.xlane.xlu0 %1211 }
 0x5f9   :  { %v1226_v41 = vmul.f32 0.001953125, %v1212_v33 }
 0x5fa   :  { %v1225_v23 = vpop.xlane.xlu1 %1224 }
 0x5fb   :  { %v1228_v6 = vmul.f32 %v1226_v41, %v1226_v41  ;;  %v1227_v61 = vmul.f32 0.001953125, %v1225_v23 }
 0x5fd   :  { %v1229_v47 = vsub.f32 %v1227_v61, %v1228_v6 }
 0x5ff   :  { %v1231_v24 = vadd.f32 1e-05, %v1229_v47 }
 0x601   :  { %1350 = vrsqrt.f32 %v1231_v24 }
 0x60e   :  { %v1351_v62 = vpop.eup %1350 }
 0x60f   :  { %v1233_v25 = vmul.f32 %v1351_v62, %v1230_v46 }
 0x611   :  { %1239 = vperm.xlu0 %1330, %v1233_v25   ;;  %v1235_v10 = vmul.f32 %v1233_v25, %v1226_v41 }
 0x613   :  { %v1236_v42 = vsub.f32 %v1234_v5, %v1235_v10 }
 0x615   :  { %1248 = vperm.xlu1 %1331, %v1236_v42  }
 0x68c   :  { %v1240_v12 = vpop.permute.xlu0 %1239 }
 0x68d   :  { %v1242_v2 = vmul.f32 %v1240_v12, %v1128_v60  ;;  %v1243_v44 = vmul.f32 %v1240_v12, %v1130_v39  ;;  %v1244_v51 = vmul.f32 %v1240_v12, %v1199_v54  ;;  %v1245_v26 = vmul.f32 %v1240_v12, %v1201_v16 }
 0x690   :  { %v1249_v29 = vpop.permute.xlu1 %1248 }
 0x691   :  { %v1251_v4 = vadd.f32 %v1249_v29, %v1242_v2  ;;  %v1252_v56 = vadd.f32 %v1249_v29, %v1243_v44  ;;  %v1253_v45 = vadd.f32 %v1249_v29, %v1244_v51  ;;  %v1254_v1 = vadd.f32 %v1249_v29, %v1245_v26 }
 0x693   :  { %v1255_v17 = vmax.f32 %v1251_v4, 0.0  ;;  %v1256_v20 = vmax.f32 %v1252_v56, 0.0  ;;  %v1257_v30 = vmax.f32 %v1253_v45, 0.0  ;;  %v1258_v31 = vmax.f32 %v1254_v1, 0.0 }
 0x695   :  { %v1263_v7 = vadd.f32 %v1259_v35, %v1255_v17  ;;  %v1264_v48 = vadd.f32 %v1261_v27, %v1256_v20  ;;  %v1277_v38 = vadd.f32 %v1315_v14, %v1257_v30  ;;  %v1278_v32 = vadd.f32 %v1275_v28, %v1258_v31 }
 0x697   :  { %v1265_v49 = vmax.f32 %v1263_v7, 0.0  ;;  %v1266_v18 = vmax.f32 %v1264_v48, 0.0  ;;  %v1279_v19 = vmax.f32 %v1277_v38, 0.0  ;;  %v1280_v34 = vmax.f32 %v1278_v32, 0.0 }
 0x699   :  { %v1269_v36 = vcombine.low %v1265_v49, %v1266_v18  ;;  %v1283_v52 = vcombine.low %v1279_v19, %v1280_v34 }
 0x69b   :  { %1271 = vst [vmem:[#allocation4] sm:$0xff] %v1269_v36  ;;  %1286 = vst [vmem:[#allocation4 + $0x8] sm:$0xff] %v1283_v52 }
 0x69c   :  { %1363 = shalt.err (!%p1360_p4)
}
 0x69d   :  { %s1386_s26 = smov 128   ;;  %s1387_s27 = smov 8  }
 0x69e   :  { %1298 = dma.vmem_to_hbm [thread:$0]  %s1293_s5, 256, %s1993_s7, [#allocation5], %s1386_s26, %s1386_s26, %s1387_s27  }
 0x69f   :  { %1372 = dma.done.wait [#allocation5], 256  }
 0x6a0   :  { %1373 = vsyncadd [#allocation5], 4294967040 }
 0x6a1   :  { %1302 = vsyncpa [#allocation5], 1 }

</bundles_post_ra>
